<compile_context>
chip_gen: v6e
topology: v6e:2x2x1
jax: 0.10.0
libtpu: 0.0.40
codegen_flags: <defaults>
</compile_context>

<pallas_src>
import functools

import jax
import jax.numpy as jnp
from jax.experimental import pallas as pl
from jax.experimental.pallas import tpu as pltpu


# ----------------------------------------------------------------------------
# Fused kernel: LSTM recurrence + final Linear + log_softmax(x, dim=1).
# Single grid step; everything resident in VMEM; loops fully unrolled.
# ----------------------------------------------------------------------------
def _simple_lstm_kernel(x_tbi_ref, x_bsi_ref, w_ref, b_ref, wfc_ref, bfc_ref,
                        ls_out_ref, fc_out_ref,
                        *, num_layers, hidden_size, seq_len):
    H = hidden_size
    batch = x_tbi_ref.shape[1]

    # ---- log_softmax(x, dim=1) on the batch-first input (module's return) ----
    xb = x_bsi_ref[...]                               # (batch, seq, input)
    m = jnp.max(xb, axis=1, keepdims=True)
    y = xb - m
    lse = jnp.log(jnp.sum(jnp.exp(y), axis=1, keepdims=True))
    ls_out_ref[...] = y - lse

    # ---- LSTM recurrence (seq_len and num_layers are small & static) --------
    # Lane mask selecting the `g` gate columns [2H, 3H) -- hoisted out of loops.
    lane = jax.lax.broadcasted_iota(jnp.int32, (batch, 4 * H), 1)
    g_mask = (lane >= 2 * H) & (lane < 3 * H)

    h = [jnp.zeros((batch, H), jnp.float32) for _ in range(num_layers)]
    c = [jnp.zeros((batch, H), jnp.float32) for _ in range(num_layers)]

    for t in range(seq_len):                          # static -> full unroll
        inp = x_tbi_ref[t]                            # (batch, input_size)
        for l in range(num_layers):                   # static, small
            xh = jnp.concatenate([inp, h[l]], axis=1)         # (batch, 2H)
            gates = (jnp.dot(xh, w_ref[l],
                             preferred_element_type=jnp.float32)
                     + b_ref[l])                              # (batch, 4H)
            # Full-width transcendentals on the EUP; VPU select for the g lanes.
            act = jnp.where(g_mask, jnp.tanh(gates), jax.nn.sigmoid(gates))
            i = act[:, 0 * H:1 * H]
            f = act[:, 1 * H:2 * H]
            g = act[:, 2 * H:3 * H]
            o = act[:, 3 * H:4 * H]
            c[l] = f * c[l] + i * g
            h[l] = o * jnp.tanh(c[l])
            inp = h[l]

    # ---- fc(out[:, -1, :]) epilogue: one unconditional store ----------------
    fc_out_ref[...] = (
        jnp.dot(h[num_layers - 1], wfc_ref[...],
                preferred_element_type=jnp.float32)
        + bfc_ref[...]
    )


def simple_lstm_forward(x_bsi, params, *, num_layers, hidden_size):
    """x_bsi: (batch, seq, input_size), batch-first like PyTorch.

    Returns (log_softmax(x, dim=1), fc(out[:, -1, :])).  The first element is
    what simpleLSTM.forward returns; the second is the LSTM+fc value it
    computes and discards.
    """
    batch, seq, input_size = x_bsi.shape
    num_classes = params["w_fc"].shape[1]
    x_tbi = jnp.transpose(x_bsi, (1, 0, 2))           # time-major for the loop

    kernel = functools.partial(
        _simple_lstm_kernel,
        num_layers=num_layers, hidden_size=hidden_size, seq_len=seq)

    ls_out, fc_out = pl.pallas_call(
        kernel,
        out_shape=(
            jax.ShapeDtypeStruct((batch, seq, input_size), jnp.float32),
            jax.ShapeDtypeStruct((batch, num_classes), jnp.float32),
        ),
        grid_spec=pltpu.PrefetchScalarGridSpec(
            num_scalar_prefetch=0,
            grid=(1,),                                # single step: whole
            in_specs=[                                # problem resident in VMEM
                pl.BlockSpec(x_tbi.shape, lambda n: (0, 0, 0)),
                pl.BlockSpec(x_bsi.shape, lambda n: (0, 0, 0)),
                pl.BlockSpec(params["w"].shape, lambda n: (0, 0, 0)),
                pl.BlockSpec(params["b"].shape, lambda n: (0, 0, 0)),
                pl.BlockSpec(params["w_fc"].shape, lambda n: (0, 0)),
                pl.BlockSpec(params["b_fc"].shape, lambda n: (0, 0)),
            ],
            out_specs=[
                pl.BlockSpec((batch, seq, input_size), lambda n: (0, 0, 0)),
                pl.BlockSpec((batch, num_classes), lambda n: (0, 0)),
            ],
        ),
        compiler_params=pltpu.CompilerParams(
            dimension_semantics=("arbitrary",)),
    )(x_tbi, x_bsi, params["w"], params["b"], params["w_fc"], params["b_fc"])
    return ls_out, fc_out


# ----------------------------------------------------------------------------
# Parameter init (PyTorch-style U(-1/sqrt(H), 1/sqrt(H)), deterministic).
# Weights are pre-transposed and fused: w[l] = [W_ih_l^T ; W_hh_l^T]  (2H, 4H),
# b[l] = b_ih_l + b_hh_l  (1, 4H).  Gate order (i, f, g, o) matches PyTorch.
# ----------------------------------------------------------------------------
def init_params(key, input_size, hidden_size, num_layers, num_classes):
    # NOTE: requires input_size == hidden_size so layer weights stack uniformly.
    assert input_size == hidden_size
    k = 1.0 / jnp.sqrt(jnp.float32(hidden_size))
    keys = jax.random.split(key, 6)
    H4 = 4 * hidden_size
    w_ih = jax.random.uniform(keys[0], (num_layers, input_size, H4),
                              jnp.float32, -k, k)
    w_hh = jax.random.uniform(keys[1], (num_layers, hidden_size, H4),
                              jnp.float32, -k, k)
    b_ih = jax.random.uniform(keys[2], (num_layers, 1, H4), jnp.float32, -k, k)
    b_hh = jax.random.uniform(keys[3], (num_layers, 1, H4), jnp.float32, -k, k)
    w_fc = jax.random.uniform(keys[4], (hidden_size, num_classes),
                              jnp.float32, -k, k)
    b_fc = jax.random.uniform(keys[5], (1, num_classes), jnp.float32, -k, k)
    return {
        "w": jnp.concatenate([w_ih, w_hh], axis=1),   # (L, 2H, 4H)
        "b": b_ih + b_hh,                             # (L, 1, 4H)
        "w_fc": w_fc,                                 # (H, C)
        "b_fc": b_fc,                                 # (1, C)
    }


# ----------------------------------------------------------------------------
# Pure-JAX reference (for correctness checking).
# ----------------------------------------------------------------------------
def _ref_lstm_fc(x_bsi, params, *, num_layers, hidden_size):
    H = hidden_size
    batch, seq, _ = x_bsi.shape
    hp = jax.lax.Precision.HIGHEST
    h = [jnp.zeros((batch, H), jnp.float32) for _ in range(num_layers)]
    c = [jnp.zeros((batch, H), jnp.float32) for _ in range(num_layers)]
    for t in range(seq):
        inp = x_bsi[:, t, :]
        for l in range(num_layers):
            xh = jnp.concatenate([inp, h[l]], axis=1)
            gates = jnp.dot(xh, params["w"][l], precision=hp) + params["b"][l]
            i = jax.nn.sigmoid(gates[:, 0 * H:1 * H])
            f = jax.nn.sigmoid(gates[:, 1 * H:2 * H])
            g = jnp.tanh(gates[:, 2 * H:3 * H])
            o = jax.nn.sigmoid(gates[:, 3 * H:4 * H])
            c[l] = f * c[l] + i * g
            h[l] = o * jnp.tanh(c[l])
            inp = h[l]
    return jnp.dot(h[-1], params["w_fc"], precision=hp) + params["b_fc"]


if __name__ == "__main__":
    # Small shapes consistent with the module.
    batch, seq = 2, 8
    input_size = hidden_size = 32
    num_layers = 2
    num_classes = 8

    key = jax.random.PRNGKey(0)
    kx, kp = jax.random.split(key)
    x = jax.random.normal(kx, (batch, seq, input_size), jnp.float32)
    params = init_params(kp, input_size, hidden_size, num_layers, num_classes)

    out, fc_out = simple_lstm_forward(
        x, params, num_layers=num_layers, hidden_size=hidden_size)
    jax.block_until_ready(out)
    jax.block_until_ready(fc_out)

    # The value forward() actually returns: log_softmax(x, dim=1).
    ref_ls = jax.nn.log_softmax(x, axis=1)
    assert out.shape == (batch, seq, input_size)
    assert jnp.allclose(out, ref_ls, atol=1e-5), "log_softmax mismatch"

    # The value forward() computes and discards: fc(out[:, -1, :]).
    ref_fc = _ref_lstm_fc(x, params,
                          num_layers=num_layers, hidden_size=hidden_size)
    assert fc_out.shape == (batch, num_classes)
    assert jnp.allclose(fc_out, ref_fc, atol=1e-3, rtol=1e-3), "LSTM+fc mismatch"

    print("KERNEL_OK")
</pallas_src>

<mosaic_0001>
module attributes {stable_mosaic.version = 11 : i64} {
  func.func @_simple_lstm_kernel(%arg0: i32, %arg1: memref<8x2x32xf32, #tpu.memory_space<vmem>>, %arg2: memref<2x8x32xf32, #tpu.memory_space<vmem>>, %arg3: memref<2x64x128xf32, #tpu.memory_space<vmem>>, %arg4: memref<2x1x128xf32, #tpu.memory_space<vmem>>, %arg5: memref<32x8xf32, #tpu.memory_space<vmem>>, %arg6: memref<1x8xf32, #tpu.memory_space<vmem>>, %arg7: memref<2x8x32xf32, #tpu.memory_space<vmem>>, %arg8: memref<2x8xf32, #tpu.memory_space<vmem>>) attributes {dimension_semantics = [#tpu.dimension_semantics<arbitrary>], iteration_bounds = array<i64: 1>, scalar_prefetch = 0 : i64, scratch_operands = 0 : i64, tpu.core_type = #tpu.core_type<tc>, window_params = [{pipeline_mode = #tpu.pipeline_mode<synchronous>, transform_indices = @transform_0, window_bounds = array<i64: 8, 2, 32>}, {pipeline_mode = #tpu.pipeline_mode<synchronous>, transform_indices = @transform_1, window_bounds = array<i64: 2, 8, 32>}, {pipeline_mode = #tpu.pipeline_mode<synchronous>, transform_indices = @transform_2, window_bounds = array<i64: 2, 64, 128>}, {pipeline_mode = #tpu.pipeline_mode<synchronous>, transform_indices = @transform_3, window_bounds = array<i64: 2, 1, 128>}, {pipeline_mode = #tpu.pipeline_mode<synchronous>, transform_indices = @transform_4, window_bounds = array<i64: 32, 8>}, {pipeline_mode = #tpu.pipeline_mode<synchronous>, transform_indices = @transform_5, window_bounds = array<i64: 1, 8>}, {pipeline_mode = #tpu.pipeline_mode<synchronous>, transform_indices = @transform_6, window_bounds = array<i64: 2, 8, 32>}, {pipeline_mode = #tpu.pipeline_mode<synchronous>, transform_indices = @transform_7, window_bounds = array<i64: 2, 8>}]} {
    %c0 = arith.constant 0 : index
    %c0_0 = arith.constant 0 : index
    %c0_1 = arith.constant 0 : index
    %0 = vector.load %arg2[%c0, %c0_0, %c0_1] : memref<2x8x32xf32, #tpu.memory_space<vmem>>, vector<2x8x32xf32>
    %cst = arith.constant dense<0xFF800000> : vector<2x32xf32>
    %1 = vector.multi_reduction <maximumf>, %0, %cst [1] : vector<2x8x32xf32> to vector<2x32xf32>
    %2 = vector.shape_cast %1 : vector<2x32xf32> to vector<2x1x32xf32>
    %3 = vector.broadcast %2 : vector<2x1x32xf32> to vector<2x8x32xf32>
    %4 = arith.subf %0, %3 : vector<2x8x32xf32>
    %5 = math.exp %4 : vector<2x8x32xf32>
    %cst_2 = arith.constant dense<0.000000e+00> : vector<2x32xf32>
    %6 = vector.multi_reduction <add>, %5, %cst_2 [1] : vector<2x8x32xf32> to vector<2x32xf32>
    %7 = vector.shape_cast %6 : vector<2x32xf32> to vector<2x1x32xf32>
    %8 = math.log %7 : vector<2x1x32xf32>
    %9 = vector.broadcast %8 : vector<2x1x32xf32> to vector<2x8x32xf32>
    %10 = arith.subf %4, %9 : vector<2x8x32xf32>
    %c0_3 = arith.constant 0 : index
    %c0_4 = arith.constant 0 : index
    %c0_5 = arith.constant 0 : index
    %11 = vector.load %arg7[%c0_3, %c0_4, %c0_5] : memref<2x8x32xf32, #tpu.memory_space<vmem>>, vector<2x8x32xf32>
    tpu.vector_store %arg7[%c0_3, %c0_4, %c0_5], %10 {strides = array<i32>} : memref<2x8x32xf32, #tpu.memory_space<vmem>>, vector<2x8x32xf32>,
    %12 = tpu.iota {dimensions = array<i32: 1>} : vector<2x128xi32>
    %c64_i32 = arith.constant 64 : i32
    %13 = vector.broadcast %c64_i32 : i32 to vector<2x128xi32>
    %14 = arith.cmpi sge, %12, %13 : vector<2x128xi32>
    %c96_i32 = arith.constant 96 : i32
    %15 = vector.broadcast %c96_i32 : i32 to vector<2x128xi32>
    %16 = arith.cmpi slt, %12, %15 : vector<2x128xi32>
    %17 = arith.andi %14, %16 : vector<2x128xi1>
    %cst_6 = arith.constant 0.000000e+00 : f32
    %18 = vector.broadcast %cst_6 : f32 to vector<2x32xf32>
    %cst_7 = arith.constant 0.000000e+00 : f32
    %19 = vector.broadcast %cst_7 : f32 to vector<2x32xf32>
    %cst_8 = arith.constant 0.000000e+00 : f32
    %20 = vector.broadcast %cst_8 : f32 to vector<2x32xf32>
    %cst_9 = arith.constant 0.000000e+00 : f32
    %21 = vector.broadcast %cst_9 : f32 to vector<2x32xf32>
    %c0_10 = arith.constant 0 : index
    %c0_11 = arith.constant 0 : index
    %c0_12 = arith.constant 0 : index
    %22 = vector.load %arg1[%c0_10, %c0_11, %c0_12] : memref<8x2x32xf32, #tpu.memory_space<vmem>>, vector<1x2x32xf32>
    %23 = vector.shape_cast %22 : vector<1x2x32xf32> to vector<2x32xf32>
    %24 = tpu.concatenate %23, %18 in 1 : vector<2x32xf32>, vector<2x32xf32> -> vector<2x64xf32>
    %c0_13 = arith.constant 0 : index
    %c0_14 = arith.constant 0 : index
    %c0_15 = arith.constant 0 : index
    %25 = vector.load %arg3[%c0_13, %c0_14, %c0_15] : memref<2x64x128xf32, #tpu.memory_space<vmem>>, vector<1x64x128xf32>
    %26 = vector.shape_cast %25 : vector<1x64x128xf32> to vector<64x128xf32>
    %cst_16 = arith.constant dense<0.000000e+00> : vector<2x128xf32>
    %27 = tpu.matmul %24, %26, %cst_16 {dimension_numbers = #tpu.dot_dimension_numbers<[1], [0], [0], [1], [0, 0, 1, 1], [], []>} : vector<2x64xf32>, vector<64x128xf32>, vector<2x128xf32> -> vector<2x128xf32>
    %c0_17 = arith.constant 0 : index
    %c0_18 = arith.constant 0 : index
    %c0_19 = arith.constant 0 : index
    %28 = vector.load %arg4[%c0_17, %c0_18, %c0_19] : memref<2x1x128xf32, #tpu.memory_space<vmem>>, vector<1x1x128xf32>
    %29 = vector.shape_cast %28 : vector<1x1x128xf32> to vector<1x128xf32>
    %30 = vector.broadcast %29 : vector<1x128xf32> to vector<2x128xf32>
    %31 = arith.addf %27, %30 : vector<2x128xf32>
    %32 = math.tanh %31 : vector<2x128xf32>
    %33 = arith.negf %31 : vector<2x128xf32>
    %34 = math.exp %33 : vector<2x128xf32>
    %cst_20 = arith.constant 1.000000e+00 : f32
    %35 = vector.broadcast %cst_20 : f32 to vector<2x128xf32>
    %36 = arith.addf %35, %34 : vector<2x128xf32>
    %37 = arith.divf %35, %36 : vector<2x128xf32>
    %38 = arith.select %17, %32, %37 : vector<2x128xi1>, vector<2x128xf32>
    %39 = vector.extract_strided_slice %38 {offsets = [0, 0], sizes = [2, 32], strides = [1, 1]} : vector<2x128xf32> to vector<2x32xf32>
    %40 = vector.extract_strided_slice %38 {offsets = [0, 32], sizes = [2, 32], strides = [1, 1]} : vector<2x128xf32> to vector<2x32xf32>
    %41 = vector.extract_strided_slice %38 {offsets = [0, 64], sizes = [2, 32], strides = [1, 1]} : vector<2x128xf32> to vector<2x32xf32>
    %42 = vector.extract_strided_slice %38 {offsets = [0, 96], sizes = [2, 32], strides = [1, 1]} : vector<2x128xf32> to vector<2x32xf32>
    %43 = arith.mulf %40, %20 : vector<2x32xf32>
    %44 = arith.mulf %39, %41 : vector<2x32xf32>
    %45 = arith.addf %43, %44 : vector<2x32xf32>
    %46 = math.tanh %45 : vector<2x32xf32>
    %47 = arith.mulf %42, %46 : vector<2x32xf32>
    %48 = tpu.concatenate %47, %19 in 1 : vector<2x32xf32>, vector<2x32xf32> -> vector<2x64xf32>
    %c1 = arith.constant 1 : index
    %c0_21 = arith.constant 0 : index
    %c0_22 = arith.constant 0 : index
    %49 = vector.load %arg3[%c1, %c0_21, %c0_22] : memref<2x64x128xf32, #tpu.memory_space<vmem>>, vector<1x64x128xf32>
    %50 = vector.shape_cast %49 : vector<1x64x128xf32> to vector<64x128xf32>
    %cst_23 = arith.constant dense<0.000000e+00> : vector<2x128xf32>
    %51 = tpu.matmul %48, %50, %cst_23 {dimension_numbers = #tpu.dot_dimension_numbers<[1], [0], [0], [1], [0, 0, 1, 1], [], []>} : vector<2x64xf32>, vector<64x128xf32>, vector<2x128xf32> -> vector<2x128xf32>
    %c1_24 = arith.constant 1 : index
    %c0_25 = arith.constant 0 : index
    %c0_26 = arith.constant 0 : index
    %52 = vector.load %arg4[%c1_24, %c0_25, %c0_26] : memref<2x1x128xf32, #tpu.memory_space<vmem>>, vector<1x1x128xf32>
    %53 = vector.shape_cast %52 : vector<1x1x128xf32> to vector<1x128xf32>
    %54 = vector.broadcast %53 : vector<1x128xf32> to vector<2x128xf32>
    %55 = arith.addf %51, %54 : vector<2x128xf32>
    %56 = math.tanh %55 : vector<2x128xf32>
    %57 = arith.negf %55 : vector<2x128xf32>
    %58 = math.exp %57 : vector<2x128xf32>
    %cst_27 = arith.constant 1.000000e+00 : f32
    %59 = vector.broadcast %cst_27 : f32 to vector<2x128xf32>
    %60 = arith.addf %59, %58 : vector<2x128xf32>
    %61 = arith.divf %59, %60 : vector<2x128xf32>
    %62 = arith.select %17, %56, %61 : vector<2x128xi1>, vector<2x128xf32>
    %63 = vector.extract_strided_slice %62 {offsets = [0, 0], sizes = [2, 32], strides = [1, 1]} : vector<2x128xf32> to vector<2x32xf32>
    %64 = vector.extract_strided_slice %62 {offsets = [0, 32], sizes = [2, 32], strides = [1, 1]} : vector<2x128xf32> to vector<2x32xf32>
    %65 = vector.extract_strided_slice %62 {offsets = [0, 64], sizes = [2, 32], strides = [1, 1]} : vector<2x128xf32> to vector<2x32xf32>
    %66 = vector.extract_strided_slice %62 {offsets = [0, 96], sizes = [2, 32], strides = [1, 1]} : vector<2x128xf32> to vector<2x32xf32>
    %67 = arith.mulf %64, %21 : vector<2x32xf32>
    %68 = arith.mulf %63, %65 : vector<2x32xf32>
    %69 = arith.addf %67, %68 : vector<2x32xf32>
    %70 = math.tanh %69 : vector<2x32xf32>
    %71 = arith.mulf %66, %70 : vector<2x32xf32>
    %c1_28 = arith.constant 1 : index
    %c0_29 = arith.constant 0 : index
    %c0_30 = arith.constant 0 : index
    %72 = vector.load %arg1[%c1_28, %c0_29, %c0_30] : memref<8x2x32xf32, #tpu.memory_space<vmem>>, vector<1x2x32xf32>
    %73 = vector.shape_cast %72 : vector<1x2x32xf32> to vector<2x32xf32>
    %74 = tpu.concatenate %73, %47 in 1 : vector<2x32xf32>, vector<2x32xf32> -> vector<2x64xf32>
    %c0_31 = arith.constant 0 : index
    %c0_32 = arith.constant 0 : index
    %c0_33 = arith.constant 0 : index
    %75 = vector.load %arg3[%c0_31, %c0_32, %c0_33] : memref<2x64x128xf32, #tpu.memory_space<vmem>>, vector<1x64x128xf32>
    %76 = vector.shape_cast %75 : vector<1x64x128xf32> to vector<64x128xf32>
    %cst_34 = arith.constant dense<0.000000e+00> : vector<2x128xf32>
    %77 = tpu.matmul %74, %76, %cst_34 {dimension_numbers = #tpu.dot_dimension_numbers<[1], [0], [0], [1], [0, 0, 1, 1], [], []>} : vector<2x64xf32>, vector<64x128xf32>, vector<2x128xf32> -> vector<2x128xf32>
    %c0_35 = arith.constant 0 : index
    %c0_36 = arith.constant 0 : index
    %c0_37 = arith.constant 0 : index
    %78 = vector.load %arg4[%c0_35, %c0_36, %c0_37] : memref<2x1x128xf32, #tpu.memory_space<vmem>>, vector<1x1x128xf32>
    %79 = vector.shape_cast %78 : vector<1x1x128xf32> to vector<1x128xf32>
    %80 = vector.broadcast %79 : vector<1x128xf32> to vector<2x128xf32>
    %81 = arith.addf %77, %80 : vector<2x128xf32>
    %82 = math.tanh %81 : vector<2x128xf32>
    %83 = arith.negf %81 : vector<2x128xf32>
    %84 = math.exp %83 : vector<2x128xf32>
    %cst_38 = arith.constant 1.000000e+00 : f32
    %85 = vector.broadcast %cst_38 : f32 to vector<2x128xf32>
    %86 = arith.addf %85, %84 : vector<2x128xf32>
    %87 = arith.divf %85, %86 : vector<2x128xf32>
    %88 = arith.select %17, %82, %87 : vector<2x128xi1>, vector<2x128xf32>
    %89 = vector.extract_strided_slice %88 {offsets = [0, 0], sizes = [2, 32], strides = [1, 1]} : vector<2x128xf32> to vector<2x32xf32>
    %90 = vector.extract_strided_slice %88 {offsets = [0, 32], sizes = [2, 32], strides = [1, 1]} : vector<2x128xf32> to vector<2x32xf32>
    %91 = vector.extract_strided_slice %88 {offsets = [0, 64], sizes = [2, 32], strides = [1, 1]} : vector<2x128xf32> to vector<2x32xf32>
    %92 = vector.extract_strided_slice %88 {offsets = [0, 96], sizes = [2, 32], strides = [1, 1]} : vector<2x128xf32> to vector<2x32xf32>
    %93 = arith.mulf %90, %45 : vector<2x32xf32>
    %94 = arith.mulf %89, %91 : vector<2x32xf32>
    %95 = arith.addf %93, %94 : vector<2x32xf32>
    %96 = math.tanh %95 : vector<2x32xf32>
    %97 = arith.mulf %92, %96 : vector<2x32xf32>
    %98 = tpu.concatenate %97, %71 in 1 : vector<2x32xf32>, vector<2x32xf32> -> vector<2x64xf32>
    %c1_39 = arith.constant 1 : index
    %c0_40 = arith.constant 0 : index
    %c0_41 = arith.constant 0 : index
    %99 = vector.load %arg3[%c1_39, %c0_40, %c0_41] : memref<2x64x128xf32, #tpu.memory_space<vmem>>, vector<1x64x128xf32>
    %100 = vector.shape_cast %99 : vector<1x64x128xf32> to vector<64x128xf32>
    %cst_42 = arith.constant dense<0.000000e+00> : vector<2x128xf32>
    %101 = tpu.matmul %98, %100, %cst_42 {dimension_numbers = #tpu.dot_dimension_numbers<[1], [0], [0], [1], [0, 0, 1, 1], [], []>} : vector<2x64xf32>, vector<64x128xf32>, vector<2x128xf32> -> vector<2x128xf32>
    %c1_43 = arith.constant 1 : index
    %c0_44 = arith.constant 0 : index
    %c0_45 = arith.constant 0 : index
    %102 = vector.load %arg4[%c1_43, %c0_44, %c0_45] : memref<2x1x128xf32, #tpu.memory_space<vmem>>, vector<1x1x128xf32>
    %103 = vector.shape_cast %102 : vector<1x1x128xf32> to vector<1x128xf32>
    %104 = vector.broadcast %103 : vector<1x128xf32> to vector<2x128xf32>
    %105 = arith.addf %101, %104 : vector<2x128xf32>
    %106 = math.tanh %105 : vector<2x128xf32>
    %107 = arith.negf %105 : vector<2x128xf32>
    %108 = math.exp %107 : vector<2x128xf32>
    %cst_46 = arith.constant 1.000000e+00 : f32
    %109 = vector.broadcast %cst_46 : f32 to vector<2x128xf32>
    %110 = arith.addf %109, %108 : vector<2x128xf32>
    %111 = arith.divf %109, %110 : vector<2x128xf32>
    %112 = arith.select %17, %106, %111 : vector<2x128xi1>, vector<2x128xf32>
    %113 = vector.extract_strided_slice %112 {offsets = [0, 0], sizes = [2, 32], strides = [1, 1]} : vector<2x128xf32> to vector<2x32xf32>
    %114 = vector.extract_strided_slice %112 {offsets = [0, 32], sizes = [2, 32], strides = [1, 1]} : vector<2x128xf32> to vector<2x32xf32>
    %115 = vector.extract_strided_slice %112 {offsets = [0, 64], sizes = [2, 32], strides = [1, 1]} : vector<2x128xf32> to vector<2x32xf32>
    %116 = vector.extract_strided_slice %112 {offsets = [0, 96], sizes = [2, 32], strides = [1, 1]} : vector<2x128xf32> to vector<2x32xf32>
    %117 = arith.mulf %114, %69 : vector<2x32xf32>
    %118 = arith.mulf %113, %115 : vector<2x32xf32>
    %119 = arith.addf %117, %118 : vector<2x32xf32>
    %120 = math.tanh %119 : vector<2x32xf32>
    %121 = arith.mulf %116, %120 : vector<2x32xf32>
    %c2 = arith.constant 2 : index
    %c0_47 = arith.constant 0 : index
    %c0_48 = arith.constant 0 : index
    %122 = vector.load %arg1[%c2, %c0_47, %c0_48] : memref<8x2x32xf32, #tpu.memory_space<vmem>>, vector<1x2x32xf32>
    %123 = vector.shape_cast %122 : vector<1x2x32xf32> to vector<2x32xf32>
    %124 = tpu.concatenate %123, %97 in 1 : vector<2x32xf32>, vector<2x32xf32> -> vector<2x64xf32>
    %c0_49 = arith.constant 0 : index
    %c0_50 = arith.constant 0 : index
    %c0_51 = arith.constant 0 : index
    %125 = vector.load %arg3[%c0_49, %c0_50, %c0_51] : memref<2x64x128xf32, #tpu.memory_space<vmem>>, vector<1x64x128xf32>
    %126 = vector.shape_cast %125 : vector<1x64x128xf32> to vector<64x128xf32>
    %cst_52 = arith.constant dense<0.000000e+00> : vector<2x128xf32>
    %127 = tpu.matmul %124, %126, %cst_52 {dimension_numbers = #tpu.dot_dimension_numbers<[1], [0], [0], [1], [0, 0, 1, 1], [], []>} : vector<2x64xf32>, vector<64x128xf32>, vector<2x128xf32> -> vector<2x128xf32>
    %c0_53 = arith.constant 0 : index
    %c0_54 = arith.constant 0 : index
    %c0_55 = arith.constant 0 : index
    %128 = vector.load %arg4[%c0_53, %c0_54, %c0_55] : memref<2x1x128xf32, #tpu.memory_space<vmem>>, vector<1x1x128xf32>
    %129 = vector.shape_cast %128 : vector<1x1x128xf32> to vector<1x128xf32>
    %130 = vector.broadcast %129 : vector<1x128xf32> to vector<2x128xf32>
    %131 = arith.addf %127, %130 : vector<2x128xf32>
    %132 = math.tanh %131 : vector<2x128xf32>
    %133 = arith.negf %131 : vector<2x128xf32>
    %134 = math.exp %133 : vector<2x128xf32>
    %cst_56 = arith.constant 1.000000e+00 : f32
    %135 = vector.broadcast %cst_56 : f32 to vector<2x128xf32>
    %136 = arith.addf %135, %134 : vector<2x128xf32>
    %137 = arith.divf %135, %136 : vector<2x128xf32>
    %138 = arith.select %17, %132, %137 : vector<2x128xi1>, vector<2x128xf32>
    %139 = vector.extract_strided_slice %138 {offsets = [0, 0], sizes = [2, 32], strides = [1, 1]} : vector<2x128xf32> to vector<2x32xf32>
    %140 = vector.extract_strided_slice %138 {offsets = [0, 32], sizes = [2, 32], strides = [1, 1]} : vector<2x128xf32> to vector<2x32xf32>
    %141 = vector.extract_strided_slice %138 {offsets = [0, 64], sizes = [2, 32], strides = [1, 1]} : vector<2x128xf32> to vector<2x32xf32>
    %142 = vector.extract_strided_slice %138 {offsets = [0, 96], sizes = [2, 32], strides = [1, 1]} : vector<2x128xf32> to vector<2x32xf32>
    %143 = arith.mulf %140, %95 : vector<2x32xf32>
    %144 = arith.mulf %139, %141 : vector<2x32xf32>
    %145 = arith.addf %143, %144 : vector<2x32xf32>
    %146 = math.tanh %145 : vector<2x32xf32>
    %147 = arith.mulf %142, %146 : vector<2x32xf32>
    %148 = tpu.concatenate %147, %121 in 1 : vector<2x32xf32>, vector<2x32xf32> -> vector<2x64xf32>
    %c1_57 = arith.constant 1 : index
    %c0_58 = arith.constant 0 : index
    %c0_59 = arith.constant 0 : index
    %149 = vector.load %arg3[%c1_57, %c0_58, %c0_59] : memref<2x64x128xf32, #tpu.memory_space<vmem>>, vector<1x64x128xf32>
    %150 = vector.shape_cast %149 : vector<1x64x128xf32> to vector<64x128xf32>
    %cst_60 = arith.constant dense<0.000000e+00> : vector<2x128xf32>
    %151 = tpu.matmul %148, %150, %cst_60 {dimension_numbers = #tpu.dot_dimension_numbers<[1], [0], [0], [1], [0, 0, 1, 1], [], []>} : vector<2x64xf32>, vector<64x128xf32>, vector<2x128xf32> -> vector<2x128xf32>
    %c1_61 = arith.constant 1 : index
    %c0_62 = arith.constant 0 : index
    %c0_63 = arith.constant 0 : index
    %152 = vector.load %arg4[%c1_61, %c0_62, %c0_63] : memref<2x1x128xf32, #tpu.memory_space<vmem>>, vector<1x1x128xf32>
    %153 = vector.shape_cast %152 : vector<1x1x128xf32> to vector<1x128xf32>
    %154 = vector.broadcast %153 : vector<1x128xf32> to vector<2x128xf32>
    %155 = arith.addf %151, %154 : vector<2x128xf32>
    %156 = math.tanh %155 : vector<2x128xf32>
    %157 = arith.negf %155 : vector<2x128xf32>
    %158 = math.exp %157 : vector<2x128xf32>
    %cst_64 = arith.constant 1.000000e+00 : f32
    %159 = vector.broadcast %cst_64 : f32 to vector<2x128xf32>
    %160 = arith.addf %159, %158 : vector<2x128xf32>
    %161 = arith.divf %159, %160 : vector<2x128xf32>
    %162 = arith.select %17, %156, %161 : vector<2x128xi1>, vector<2x128xf32>
    %163 = vector.extract_strided_slice %162 {offsets = [0, 0], sizes = [2, 32], strides = [1, 1]} : vector<2x128xf32> to vector<2x32xf32>
    %164 = vector.extract_strided_slice %162 {offsets = [0, 32], sizes = [2, 32], strides = [1, 1]} : vector<2x128xf32> to vector<2x32xf32>
    %165 = vector.extract_strided_slice %162 {offsets = [0, 64], sizes = [2, 32], strides = [1, 1]} : vector<2x128xf32> to vector<2x32xf32>
    %166 = vector.extract_strided_slice %162 {offsets = [0, 96], sizes = [2, 32], strides = [1, 1]} : vector<2x128xf32> to vector<2x32xf32>
    %167 = arith.mulf %164, %119 : vector<2x32xf32>
    %168 = arith.mulf %163, %165 : vector<2x32xf32>
    %169 = arith.addf %167, %168 : vector<2x32xf32>
    %170 = math.tanh %169 : vector<2x32xf32>
    %171 = arith.mulf %166, %170 : vector<2x32xf32>
    %c3 = arith.constant 3 : index
    %c0_65 = arith.constant 0 : index
    %c0_66 = arith.constant 0 : index
    %172 = vector.load %arg1[%c3, %c0_65, %c0_66] : memref<8x2x32xf32, #tpu.memory_space<vmem>>, vector<1x2x32xf32>
    %173 = vector.shape_cast %172 : vector<1x2x32xf32> to vector<2x32xf32>
    %174 = tpu.concatenate %173, %147 in 1 : vector<2x32xf32>, vector<2x32xf32> -> vector<2x64xf32>
    %c0_67 = arith.constant 0 : index
    %c0_68 = arith.constant 0 : index
    %c0_69 = arith.constant 0 : index
    %175 = vector.load %arg3[%c0_67, %c0_68, %c0_69] : memref<2x64x128xf32, #tpu.memory_space<vmem>>, vector<1x64x128xf32>
    %176 = vector.shape_cast %175 : vector<1x64x128xf32> to vector<64x128xf32>
    %cst_70 = arith.constant dense<0.000000e+00> : vector<2x128xf32>
    %177 = tpu.matmul %174, %176, %cst_70 {dimension_numbers = #tpu.dot_dimension_numbers<[1], [0], [0], [1], [0, 0, 1, 1], [], []>} : vector<2x64xf32>, vector<64x128xf32>, vector<2x128xf32> -> vector<2x128xf32>
    %c0_71 = arith.constant 0 : index
    %c0_72 = arith.constant 0 : index
    %c0_73 = arith.constant 0 : index
    %178 = vector.load %arg4[%c0_71, %c0_72, %c0_73] : memref<2x1x128xf32, #tpu.memory_space<vmem>>, vector<1x1x128xf32>
    %179 = vector.shape_cast %178 : vector<1x1x128xf32> to vector<1x128xf32>
    %180 = vector.broadcast %179 : vector<1x128xf32> to vector<2x128xf32>
    %181 = arith.addf %177, %180 : vector<2x128xf32>
    %182 = math.tanh %181 : vector<2x128xf32>
    %183 = arith.negf %181 : vector<2x128xf32>
    %184 = math.exp %183 : vector<2x128xf32>
    %cst_74 = arith.constant 1.000000e+00 : f32
    %185 = vector.broadcast %cst_74 : f32 to vector<2x128xf32>
    %186 = arith.addf %185, %184 : vector<2x128xf32>
    %187 = arith.divf %185, %186 : vector<2x128xf32>
    %188 = arith.select %17, %182, %187 : vector<2x128xi1>, vector<2x128xf32>
    %189 = vector.extract_strided_slice %188 {offsets = [0, 0], sizes = [2, 32], strides = [1, 1]} : vector<2x128xf32> to vector<2x32xf32>
    %190 = vector.extract_strided_slice %188 {offsets = [0, 32], sizes = [2, 32], strides = [1, 1]} : vector<2x128xf32> to vector<2x32xf32>
    %191 = vector.extract_strided_slice %188 {offsets = [0, 64], sizes = [2, 32], strides = [1, 1]} : vector<2x128xf32> to vector<2x32xf32>
    %192 = vector.extract_strided_slice %188 {offsets = [0, 96], sizes = [2, 32], strides = [1, 1]} : vector<2x128xf32> to vector<2x32xf32>
    %193 = arith.mulf %190, %145 : vector<2x32xf32>
    %194 = arith.mulf %189, %191 : vector<2x32xf32>
    %195 = arith.addf %193, %194 : vector<2x32xf32>
    %196 = math.tanh %195 : vector<2x32xf32>
    %197 = arith.mulf %192, %196 : vector<2x32xf32>
    %198 = tpu.concatenate %197, %171 in 1 : vector<2x32xf32>, vector<2x32xf32> -> vector<2x64xf32>
    %c1_75 = arith.constant 1 : index
    %c0_76 = arith.constant 0 : index
    %c0_77 = arith.constant 0 : index
    %199 = vector.load %arg3[%c1_75, %c0_76, %c0_77] : memref<2x64x128xf32, #tpu.memory_space<vmem>>, vector<1x64x128xf32>
    %200 = vector.shape_cast %199 : vector<1x64x128xf32> to vector<64x128xf32>
    %cst_78 = arith.constant dense<0.000000e+00> : vector<2x128xf32>
    %201 = tpu.matmul %198, %200, %cst_78 {dimension_numbers = #tpu.dot_dimension_numbers<[1], [0], [0], [1], [0, 0, 1, 1], [], []>} : vector<2x64xf32>, vector<64x128xf32>, vector<2x128xf32> -> vector<2x128xf32>
    %c1_79 = arith.constant 1 : index
    %c0_80 = arith.constant 0 : index
    %c0_81 = arith.constant 0 : index
    %202 = vector.load %arg4[%c1_79, %c0_80, %c0_81] : memref<2x1x128xf32, #tpu.memory_space<vmem>>, vector<1x1x128xf32>
    %203 = vector.shape_cast %202 : vector<1x1x128xf32> to vector<1x128xf32>
    %204 = vector.broadcast %203 : vector<1x128xf32> to vector<2x128xf32>
    %205 = arith.addf %201, %204 : vector<2x128xf32>
    %206 = math.tanh %205 : vector<2x128xf32>
    %207 = arith.negf %205 : vector<2x128xf32>
    %208 = math.exp %207 : vector<2x128xf32>
    %cst_82 = arith.constant 1.000000e+00 : f32
    %209 = vector.broadcast %cst_82 : f32 to vector<2x128xf32>
    %210 = arith.addf %209, %208 : vector<2x128xf32>
    %211 = arith.divf %209, %210 : vector<2x128xf32>
    %212 = arith.select %17, %206, %211 : vector<2x128xi1>, vector<2x128xf32>
    %213 = vector.extract_strided_slice %212 {offsets = [0, 0], sizes = [2, 32], strides = [1, 1]} : vector<2x128xf32> to vector<2x32xf32>
    %214 = vector.extract_strided_slice %212 {offsets = [0, 32], sizes = [2, 32], strides = [1, 1]} : vector<2x128xf32> to vector<2x32xf32>
    %215 = vector.extract_strided_slice %212 {offsets = [0, 64], sizes = [2, 32], strides = [1, 1]} : vector<2x128xf32> to vector<2x32xf32>
    %216 = vector.extract_strided_slice %212 {offsets = [0, 96], sizes = [2, 32], strides = [1, 1]} : vector<2x128xf32> to vector<2x32xf32>
    %217 = arith.mulf %214, %169 : vector<2x32xf32>
    %218 = arith.mulf %213, %215 : vector<2x32xf32>
    %219 = arith.addf %217, %218 : vector<2x32xf32>
    %220 = math.tanh %219 : vector<2x32xf32>
    %221 = arith.mulf %216, %220 : vector<2x32xf32>
    %c4 = arith.constant 4 : index
    %c0_83 = arith.constant 0 : index
    %c0_84 = arith.constant 0 : index
    %222 = vector.load %arg1[%c4, %c0_83, %c0_84] : memref<8x2x32xf32, #tpu.memory_space<vmem>>, vector<1x2x32xf32>
    %223 = vector.shape_cast %222 : vector<1x2x32xf32> to vector<2x32xf32>
    %224 = tpu.concatenate %223, %197 in 1 : vector<2x32xf32>, vector<2x32xf32> -> vector<2x64xf32>
    %c0_85 = arith.constant 0 : index
    %c0_86 = arith.constant 0 : index
    %c0_87 = arith.constant 0 : index
    %225 = vector.load %arg3[%c0_85, %c0_86, %c0_87] : memref<2x64x128xf32, #tpu.memory_space<vmem>>, vector<1x64x128xf32>
    %226 = vector.shape_cast %225 : vector<1x64x128xf32> to vector<64x128xf32>
    %cst_88 = arith.constant dense<0.000000e+00> : vector<2x128xf32>
    %227 = tpu.matmul %224, %226, %cst_88 {dimension_numbers = #tpu.dot_dimension_numbers<[1], [0], [0], [1], [0, 0, 1, 1], [], []>} : vector<2x64xf32>, vector<64x128xf32>, vector<2x128xf32> -> vector<2x128xf32>
    %c0_89 = arith.constant 0 : index
    %c0_90 = arith.constant 0 : index
    %c0_91 = arith.constant 0 : index
    %228 = vector.load %arg4[%c0_89, %c0_90, %c0_91] : memref<2x1x128xf32, #tpu.memory_space<vmem>>, vector<1x1x128xf32>
    %229 = vector.shape_cast %228 : vector<1x1x128xf32> to vector<1x128xf32>
    %230 = vector.broadcast %229 : vector<1x128xf32> to vector<2x128xf32>
    %231 = arith.addf %227, %230 : vector<2x128xf32>
    %232 = math.tanh %231 : vector<2x128xf32>
    %233 = arith.negf %231 : vector<2x128xf32>
    %234 = math.exp %233 : vector<2x128xf32>
    %cst_92 = arith.constant 1.000000e+00 : f32
    %235 = vector.broadcast %cst_92 : f32 to vector<2x128xf32>
    %236 = arith.addf %235, %234 : vector<2x128xf32>
    %237 = arith.divf %235, %236 : vector<2x128xf32>
    %238 = arith.select %17, %232, %237 : vector<2x128xi1>, vector<2x128xf32>
    %239 = vector.extract_strided_slice %238 {offsets = [0, 0], sizes = [2, 32], strides = [1, 1]} : vector<2x128xf32> to vector<2x32xf32>
    %240 = vector.extract_strided_slice %238 {offsets = [0, 32], sizes = [2, 32], strides = [1, 1]} : vector<2x128xf32> to vector<2x32xf32>
    %241 = vector.extract_strided_slice %238 {offsets = [0, 64], sizes = [2, 32], strides = [1, 1]} : vector<2x128xf32> to vector<2x32xf32>
    %242 = vector.extract_strided_slice %238 {offsets = [0, 96], sizes = [2, 32], strides = [1, 1]} : vector<2x128xf32> to vector<2x32xf32>
    %243 = arith.mulf %240, %195 : vector<2x32xf32>
    %244 = arith.mulf %239, %241 : vector<2x32xf32>
    %245 = arith.addf %243, %244 : vector<2x32xf32>
    %246 = math.tanh %245 : vector<2x32xf32>
    %247 = arith.mulf %242, %246 : vector<2x32xf32>
    %248 = tpu.concatenate %247, %221 in 1 : vector<2x32xf32>, vector<2x32xf32> -> vector<2x64xf32>
    %c1_93 = arith.constant 1 : index
    %c0_94 = arith.constant 0 : index
    %c0_95 = arith.constant 0 : index
    %249 = vector.load %arg3[%c1_93, %c0_94, %c0_95] : memref<2x64x128xf32, #tpu.memory_space<vmem>>, vector<1x64x128xf32>
    %250 = vector.shape_cast %249 : vector<1x64x128xf32> to vector<64x128xf32>
    %cst_96 = arith.constant dense<0.000000e+00> : vector<2x128xf32>
    %251 = tpu.matmul %248, %250, %cst_96 {dimension_numbers = #tpu.dot_dimension_numbers<[1], [0], [0], [1], [0, 0, 1, 1], [], []>} : vector<2x64xf32>, vector<64x128xf32>, vector<2x128xf32> -> vector<2x128xf32>
    %c1_97 = arith.constant 1 : index
    %c0_98 = arith.constant 0 : index
    %c0_99 = arith.constant 0 : index
    %252 = vector.load %arg4[%c1_97, %c0_98, %c0_99] : memref<2x1x128xf32, #tpu.memory_space<vmem>>, vector<1x1x128xf32>
    %253 = vector.shape_cast %252 : vector<1x1x128xf32> to vector<1x128xf32>
    %254 = vector.broadcast %253 : vector<1x128xf32> to vector<2x128xf32>
    %255 = arith.addf %251, %254 : vector<2x128xf32>
    %256 = math.tanh %255 : vector<2x128xf32>
    %257 = arith.negf %255 : vector<2x128xf32>
    %258 = math.exp %257 : vector<2x128xf32>
    %cst_100 = arith.constant 1.000000e+00 : f32
    %259 = vector.broadcast %cst_100 : f32 to vector<2x128xf32>
    %260 = arith.addf %259, %258 : vector<2x128xf32>
    %261 = arith.divf %259, %260 : vector<2x128xf32>
    %262 = arith.select %17, %256, %261 : vector<2x128xi1>, vector<2x128xf32>
    %263 = vector.extract_strided_slice %262 {offsets = [0, 0], sizes = [2, 32], strides = [1, 1]} : vector<2x128xf32> to vector<2x32xf32>
    %264 = vector.extract_strided_slice %262 {offsets = [0, 32], sizes = [2, 32], strides = [1, 1]} : vector<2x128xf32> to vector<2x32xf32>
    %265 = vector.extract_strided_slice %262 {offsets = [0, 64], sizes = [2, 32], strides = [1, 1]} : vector<2x128xf32> to vector<2x32xf32>
    %266 = vector.extract_strided_slice %262 {offsets = [0, 96], sizes = [2, 32], strides = [1, 1]} : vector<2x128xf32> to vector<2x32xf32>
    %267 = arith.mulf %264, %219 : vector<2x32xf32>
    %268 = arith.mulf %263, %265 : vector<2x32xf32>
    %269 = arith.addf %267, %268 : vector<2x32xf32>
    %270 = math.tanh %269 : vector<2x32xf32>
    %271 = arith.mulf %266, %270 : vector<2x32xf32>
    %c5 = arith.constant 5 : index
    %c0_101 = arith.constant 0 : index
    %c0_102 = arith.constant 0 : index
    %272 = vector.load %arg1[%c5, %c0_101, %c0_102] : memref<8x2x32xf32, #tpu.memory_space<vmem>>, vector<1x2x32xf32>
    %273 = vector.shape_cast %272 : vector<1x2x32xf32> to vector<2x32xf32>
    %274 = tpu.concatenate %273, %247 in 1 : vector<2x32xf32>, vector<2x32xf32> -> vector<2x64xf32>
    %c0_103 = arith.constant 0 : index
    %c0_104 = arith.constant 0 : index
    %c0_105 = arith.constant 0 : index
    %275 = vector.load %arg3[%c0_103, %c0_104, %c0_105] : memref<2x64x128xf32, #tpu.memory_space<vmem>>, vector<1x64x128xf32>
    %276 = vector.shape_cast %275 : vector<1x64x128xf32> to vector<64x128xf32>
    %cst_106 = arith.constant dense<0.000000e+00> : vector<2x128xf32>
    %277 = tpu.matmul %274, %276, %cst_106 {dimension_numbers = #tpu.dot_dimension_numbers<[1], [0], [0], [1], [0, 0, 1, 1], [], []>} : vector<2x64xf32>, vector<64x128xf32>, vector<2x128xf32> -> vector<2x128xf32>
    %c0_107 = arith.constant 0 : index
    %c0_108 = arith.constant 0 : index
    %c0_109 = arith.constant 0 : index
    %278 = vector.load %arg4[%c0_107, %c0_108, %c0_109] : memref<2x1x128xf32, #tpu.memory_space<vmem>>, vector<1x1x128xf32>
    %279 = vector.shape_cast %278 : vector<1x1x128xf32> to vector<1x128xf32>
    %280 = vector.broadcast %279 : vector<1x128xf32> to vector<2x128xf32>
    %281 = arith.addf %277, %280 : vector<2x128xf32>
    %282 = math.tanh %281 : vector<2x128xf32>
    %283 = arith.negf %281 : vector<2x128xf32>
    %284 = math.exp %283 : vector<2x128xf32>
    %cst_110 = arith.constant 1.000000e+00 : f32
    %285 = vector.broadcast %cst_110 : f32 to vector<2x128xf32>
    %286 = arith.addf %285, %284 : vector<2x128xf32>
    %287 = arith.divf %285, %286 : vector<2x128xf32>
    %288 = arith.select %17, %282, %287 : vector<2x128xi1>, vector<2x128xf32>
    %289 = vector.extract_strided_slice %288 {offsets = [0, 0], sizes = [2, 32], strides = [1, 1]} : vector<2x128xf32> to vector<2x32xf32>
    %290 = vector.extract_strided_slice %288 {offsets = [0, 32], sizes = [2, 32], strides = [1, 1]} : vector<2x128xf32> to vector<2x32xf32>
    %291 = vector.extract_strided_slice %288 {offsets = [0, 64], sizes = [2, 32], strides = [1, 1]} : vector<2x128xf32> to vector<2x32xf32>
    %292 = vector.extract_strided_slice %288 {offsets = [0, 96], sizes = [2, 32], strides = [1, 1]} : vector<2x128xf32> to vector<2x32xf32>
    %293 = arith.mulf %290, %245 : vector<2x32xf32>
    %294 = arith.mulf %289, %291 : vector<2x32xf32>
    %295 = arith.addf %293, %294 : vector<2x32xf32>
    %296 = math.tanh %295 : vector<2x32xf32>
    %297 = arith.mulf %292, %296 : vector<2x32xf32>
    %298 = tpu.concatenate %297, %271 in 1 : vector<2x32xf32>, vector<2x32xf32> -> vector<2x64xf32>
    %c1_111 = arith.constant 1 : index
    %c0_112 = arith.constant 0 : index
    %c0_113 = arith.constant 0 : index
    %299 = vector.load %arg3[%c1_111, %c0_112, %c0_113] : memref<2x64x128xf32, #tpu.memory_space<vmem>>, vector<1x64x128xf32>
    %300 = vector.shape_cast %299 : vector<1x64x128xf32> to vector<64x128xf32>
    %cst_114 = arith.constant dense<0.000000e+00> : vector<2x128xf32>
    %301 = tpu.matmul %298, %300, %cst_114 {dimension_numbers = #tpu.dot_dimension_numbers<[1], [0], [0], [1], [0, 0, 1, 1], [], []>} : vector<2x64xf32>, vector<64x128xf32>, vector<2x128xf32> -> vector<2x128xf32>
    %c1_115 = arith.constant 1 : index
    %c0_116 = arith.constant 0 : index
    %c0_117 = arith.constant 0 : index
    %302 = vector.load %arg4[%c1_115, %c0_116, %c0_117] : memref<2x1x128xf32, #tpu.memory_space<vmem>>, vector<1x1x128xf32>
    %303 = vector.shape_cast %302 : vector<1x1x128xf32> to vector<1x128xf32>
    %304 = vector.broadcast %303 : vector<1x128xf32> to vector<2x128xf32>
    %305 = arith.addf %301, %304 : vector<2x128xf32>
    %306 = math.tanh %305 : vector<2x128xf32>
    %307 = arith.negf %305 : vector<2x128xf32>
    %308 = math.exp %307 : vector<2x128xf32>
    %cst_118 = arith.constant 1.000000e+00 : f32
    %309 = vector.broadcast %cst_118 : f32 to vector<2x128xf32>
    %310 = arith.addf %309, %308 : vector<2x128xf32>
    %311 = arith.divf %309, %310 : vector<2x128xf32>
    %312 = arith.select %17, %306, %311 : vector<2x128xi1>, vector<2x128xf32>
    %313 = vector.extract_strided_slice %312 {offsets = [0, 0], sizes = [2, 32], strides = [1, 1]} : vector<2x128xf32> to vector<2x32xf32>
    %314 = vector.extract_strided_slice %312 {offsets = [0, 32], sizes = [2, 32], strides = [1, 1]} : vector<2x128xf32> to vector<2x32xf32>
    %315 = vector.extract_strided_slice %312 {offsets = [0, 64], sizes = [2, 32], strides = [1, 1]} : vector<2x128xf32> to vector<2x32xf32>
    %316 = vector.extract_strided_slice %312 {offsets = [0, 96], sizes = [2, 32], strides = [1, 1]} : vector<2x128xf32> to vector<2x32xf32>
    %317 = arith.mulf %314, %269 : vector<2x32xf32>
    %318 = arith.mulf %313, %315 : vector<2x32xf32>
    %319 = arith.addf %317, %318 : vector<2x32xf32>
    %320 = math.tanh %319 : vector<2x32xf32>
    %321 = arith.mulf %316, %320 : vector<2x32xf32>
    %c6 = arith.constant 6 : index
    %c0_119 = arith.constant 0 : index
    %c0_120 = arith.constant 0 : index
    %322 = vector.load %arg1[%c6, %c0_119, %c0_120] : memref<8x2x32xf32, #tpu.memory_space<vmem>>, vector<1x2x32xf32>
    %323 = vector.shape_cast %322 : vector<1x2x32xf32> to vector<2x32xf32>
    %324 = tpu.concatenate %323, %297 in 1 : vector<2x32xf32>, vector<2x32xf32> -> vector<2x64xf32>
    %c0_121 = arith.constant 0 : index
    %c0_122 = arith.constant 0 : index
    %c0_123 = arith.constant 0 : index
    %325 = vector.load %arg3[%c0_121, %c0_122, %c0_123] : memref<2x64x128xf32, #tpu.memory_space<vmem>>, vector<1x64x128xf32>
    %326 = vector.shape_cast %325 : vector<1x64x128xf32> to vector<64x128xf32>
    %cst_124 = arith.constant dense<0.000000e+00> : vector<2x128xf32>
    %327 = tpu.matmul %324, %326, %cst_124 {dimension_numbers = #tpu.dot_dimension_numbers<[1], [0], [0], [1], [0, 0, 1, 1], [], []>} : vector<2x64xf32>, vector<64x128xf32>, vector<2x128xf32> -> vector<2x128xf32>
    %c0_125 = arith.constant 0 : index
    %c0_126 = arith.constant 0 : index
    %c0_127 = arith.constant 0 : index
    %328 = vector.load %arg4[%c0_125, %c0_126, %c0_127] : memref<2x1x128xf32, #tpu.memory_space<vmem>>, vector<1x1x128xf32>
    %329 = vector.shape_cast %328 : vector<1x1x128xf32> to vector<1x128xf32>
    %330 = vector.broadcast %329 : vector<1x128xf32> to vector<2x128xf32>
    %331 = arith.addf %327, %330 : vector<2x128xf32>
    %332 = math.tanh %331 : vector<2x128xf32>
    %333 = arith.negf %331 : vector<2x128xf32>
    %334 = math.exp %333 : vector<2x128xf32>
    %cst_128 = arith.constant 1.000000e+00 : f32
    %335 = vector.broadcast %cst_128 : f32 to vector<2x128xf32>
    %336 = arith.addf %335, %334 : vector<2x128xf32>
    %337 = arith.divf %335, %336 : vector<2x128xf32>
    %338 = arith.select %17, %332, %337 : vector<2x128xi1>, vector<2x128xf32>
    %339 = vector.extract_strided_slice %338 {offsets = [0, 0], sizes = [2, 32], strides = [1, 1]} : vector<2x128xf32> to vector<2x32xf32>
    %340 = vector.extract_strided_slice %338 {offsets = [0, 32], sizes = [2, 32], strides = [1, 1]} : vector<2x128xf32> to vector<2x32xf32>
    %341 = vector.extract_strided_slice %338 {offsets = [0, 64], sizes = [2, 32], strides = [1, 1]} : vector<2x128xf32> to vector<2x32xf32>
    %342 = vector.extract_strided_slice %338 {offsets = [0, 96], sizes = [2, 32], strides = [1, 1]} : vector<2x128xf32> to vector<2x32xf32>
    %343 = arith.mulf %340, %295 : vector<2x32xf32>
    %344 = arith.mulf %339, %341 : vector<2x32xf32>
    %345 = arith.addf %343, %344 : vector<2x32xf32>
    %346 = math.tanh %345 : vector<2x32xf32>
    %347 = arith.mulf %342, %346 : vector<2x32xf32>
    %348 = tpu.concatenate %347, %321 in 1 : vector<2x32xf32>, vector<2x32xf32> -> vector<2x64xf32>
    %c1_129 = arith.constant 1 : index
    %c0_130 = arith.constant 0 : index
    %c0_131 = arith.constant 0 : index
    %349 = vector.load %arg3[%c1_129, %c0_130, %c0_131] : memref<2x64x128xf32, #tpu.memory_space<vmem>>, vector<1x64x128xf32>
    %350 = vector.shape_cast %349 : vector<1x64x128xf32> to vector<64x128xf32>
    %cst_132 = arith.constant dense<0.000000e+00> : vector<2x128xf32>
    %351 = tpu.matmul %348, %350, %cst_132 {dimension_numbers = #tpu.dot_dimension_numbers<[1], [0], [0], [1], [0, 0, 1, 1], [], []>} : vector<2x64xf32>, vector<64x128xf32>, vector<2x128xf32> -> vector<2x128xf32>
    %c1_133 = arith.constant 1 : index
    %c0_134 = arith.constant 0 : index
    %c0_135 = arith.constant 0 : index
    %352 = vector.load %arg4[%c1_133, %c0_134, %c0_135] : memref<2x1x128xf32, #tpu.memory_space<vmem>>, vector<1x1x128xf32>
    %353 = vector.shape_cast %352 : vector<1x1x128xf32> to vector<1x128xf32>
    %354 = vector.broadcast %353 : vector<1x128xf32> to vector<2x128xf32>
    %355 = arith.addf %351, %354 : vector<2x128xf32>
    %356 = math.tanh %355 : vector<2x128xf32>
    %357 = arith.negf %355 : vector<2x128xf32>
    %358 = math.exp %357 : vector<2x128xf32>
    %cst_136 = arith.constant 1.000000e+00 : f32
    %359 = vector.broadcast %cst_136 : f32 to vector<2x128xf32>
    %360 = arith.addf %359, %358 : vector<2x128xf32>
    %361 = arith.divf %359, %360 : vector<2x128xf32>
    %362 = arith.select %17, %356, %361 : vector<2x128xi1>, vector<2x128xf32>
    %363 = vector.extract_strided_slice %362 {offsets = [0, 0], sizes = [2, 32], strides = [1, 1]} : vector<2x128xf32> to vector<2x32xf32>
    %364 = vector.extract_strided_slice %362 {offsets = [0, 32], sizes = [2, 32], strides = [1, 1]} : vector<2x128xf32> to vector<2x32xf32>
    %365 = vector.extract_strided_slice %362 {offsets = [0, 64], sizes = [2, 32], strides = [1, 1]} : vector<2x128xf32> to vector<2x32xf32>
    %366 = vector.extract_strided_slice %362 {offsets = [0, 96], sizes = [2, 32], strides = [1, 1]} : vector<2x128xf32> to vector<2x32xf32>
    %367 = arith.mulf %364, %319 : vector<2x32xf32>
    %368 = arith.mulf %363, %365 : vector<2x32xf32>
    %369 = arith.addf %367, %368 : vector<2x32xf32>
    %370 = math.tanh %369 : vector<2x32xf32>
    %371 = arith.mulf %366, %370 : vector<2x32xf32>
    %c7 = arith.constant 7 : index
    %c0_137 = arith.constant 0 : index
    %c0_138 = arith.constant 0 : index
    %372 = vector.load %arg1[%c7, %c0_137, %c0_138] : memref<8x2x32xf32, #tpu.memory_space<vmem>>, vector<1x2x32xf32>
    %373 = vector.shape_cast %372 : vector<1x2x32xf32> to vector<2x32xf32>
    %374 = tpu.concatenate %373, %347 in 1 : vector<2x32xf32>, vector<2x32xf32> -> vector<2x64xf32>
    %c0_139 = arith.constant 0 : index
    %c0_140 = arith.constant 0 : index
    %c0_141 = arith.constant 0 : index
    %375 = vector.load %arg3[%c0_139, %c0_140, %c0_141] : memref<2x64x128xf32, #tpu.memory_space<vmem>>, vector<1x64x128xf32>
    %376 = vector.shape_cast %375 : vector<1x64x128xf32> to vector<64x128xf32>
    %cst_142 = arith.constant dense<0.000000e+00> : vector<2x128xf32>
    %377 = tpu.matmul %374, %376, %cst_142 {dimension_numbers = #tpu.dot_dimension_numbers<[1], [0], [0], [1], [0, 0, 1, 1], [], []>} : vector<2x64xf32>, vector<64x128xf32>, vector<2x128xf32> -> vector<2x128xf32>
    %c0_143 = arith.constant 0 : index
    %c0_144 = arith.constant 0 : index
    %c0_145 = arith.constant 0 : index
    %378 = vector.load %arg4[%c0_143, %c0_144, %c0_145] : memref<2x1x128xf32, #tpu.memory_space<vmem>>, vector<1x1x128xf32>
    %379 = vector.shape_cast %378 : vector<1x1x128xf32> to vector<1x128xf32>
    %380 = vector.broadcast %379 : vector<1x128xf32> to vector<2x128xf32>
    %381 = arith.addf %377, %380 : vector<2x128xf32>
    %382 = math.tanh %381 : vector<2x128xf32>
    %383 = arith.negf %381 : vector<2x128xf32>
    %384 = math.exp %383 : vector<2x128xf32>
    %cst_146 = arith.constant 1.000000e+00 : f32
    %385 = vector.broadcast %cst_146 : f32 to vector<2x128xf32>
    %386 = arith.addf %385, %384 : vector<2x128xf32>
    %387 = arith.divf %385, %386 : vector<2x128xf32>
    %388 = arith.select %17, %382, %387 : vector<2x128xi1>, vector<2x128xf32>
    %389 = vector.extract_strided_slice %388 {offsets = [0, 0], sizes = [2, 32], strides = [1, 1]} : vector<2x128xf32> to vector<2x32xf32>
    %390 = vector.extract_strided_slice %388 {offsets = [0, 32], sizes = [2, 32], strides = [1, 1]} : vector<2x128xf32> to vector<2x32xf32>
    %391 = vector.extract_strided_slice %388 {offsets = [0, 64], sizes = [2, 32], strides = [1, 1]} : vector<2x128xf32> to vector<2x32xf32>
    %392 = vector.extract_strided_slice %388 {offsets = [0, 96], sizes = [2, 32], strides = [1, 1]} : vector<2x128xf32> to vector<2x32xf32>
    %393 = arith.mulf %390, %345 : vector<2x32xf32>
    %394 = arith.mulf %389, %391 : vector<2x32xf32>
    %395 = arith.addf %393, %394 : vector<2x32xf32>
    %396 = math.tanh %395 : vector<2x32xf32>
    %397 = arith.mulf %392, %396 : vector<2x32xf32>
    %398 = tpu.concatenate %397, %371 in 1 : vector<2x32xf32>, vector<2x32xf32> -> vector<2x64xf32>
    %c1_147 = arith.constant 1 : index
    %c0_148 = arith.constant 0 : index
    %c0_149 = arith.constant 0 : index
    %399 = vector.load %arg3[%c1_147, %c0_148, %c0_149] : memref<2x64x128xf32, #tpu.memory_space<vmem>>, vector<1x64x128xf32>
    %400 = vector.shape_cast %399 : vector<1x64x128xf32> to vector<64x128xf32>
    %cst_150 = arith.constant dense<0.000000e+00> : vector<2x128xf32>
    %401 = tpu.matmul %398, %400, %cst_150 {dimension_numbers = #tpu.dot_dimension_numbers<[1], [0], [0], [1], [0, 0, 1, 1], [], []>} : vector<2x64xf32>, vector<64x128xf32>, vector<2x128xf32> -> vector<2x128xf32>
    %c1_151 = arith.constant 1 : index
    %c0_152 = arith.constant 0 : index
    %c0_153 = arith.constant 0 : index
    %402 = vector.load %arg4[%c1_151, %c0_152, %c0_153] : memref<2x1x128xf32, #tpu.memory_space<vmem>>, vector<1x1x128xf32>
    %403 = vector.shape_cast %402 : vector<1x1x128xf32> to vector<1x128xf32>
    %404 = vector.broadcast %403 : vector<1x128xf32> to vector<2x128xf32>
    %405 = arith.addf %401, %404 : vector<2x128xf32>
    %406 = math.tanh %405 : vector<2x128xf32>
    %407 = arith.negf %405 : vector<2x128xf32>
    %408 = math.exp %407 : vector<2x128xf32>
    %cst_154 = arith.constant 1.000000e+00 : f32
    %409 = vector.broadcast %cst_154 : f32 to vector<2x128xf32>
    %410 = arith.addf %409, %408 : vector<2x128xf32>
    %411 = arith.divf %409, %410 : vector<2x128xf32>
    %412 = arith.select %17, %406, %411 : vector<2x128xi1>, vector<2x128xf32>
    %413 = vector.extract_strided_slice %412 {offsets = [0, 0], sizes = [2, 32], strides = [1, 1]} : vector<2x128xf32> to vector<2x32xf32>
    %414 = vector.extract_strided_slice %412 {offsets = [0, 32], sizes = [2, 32], strides = [1, 1]} : vector<2x128xf32> to vector<2x32xf32>
    %415 = vector.extract_strided_slice %412 {offsets = [0, 64], sizes = [2, 32], strides = [1, 1]} : vector<2x128xf32> to vector<2x32xf32>
    %416 = vector.extract_strided_slice %412 {offsets = [0, 96], sizes = [2, 32], strides = [1, 1]} : vector<2x128xf32> to vector<2x32xf32>
    %417 = arith.mulf %414, %369 : vector<2x32xf32>
    %418 = arith.mulf %413, %415 : vector<2x32xf32>
    %419 = arith.addf %417, %418 : vector<2x32xf32>
    %420 = math.tanh %419 : vector<2x32xf32>
    %421 = arith.mulf %416, %420 : vector<2x32xf32>
    %c0_155 = arith.constant 0 : index
    %c0_156 = arith.constant 0 : index
    %422 = vector.load %arg5[%c0_155, %c0_156] : memref<32x8xf32, #tpu.memory_space<vmem>>, vector<32x8xf32>
    %cst_157 = arith.constant dense<0.000000e+00> : vector<2x8xf32>
    %423 = tpu.matmul %421, %422, %cst_157 {dimension_numbers = #tpu.dot_dimension_numbers<[1], [0], [0], [1], [0, 0, 1, 1], [], []>} : vector<2x32xf32>, vector<32x8xf32>, vector<2x8xf32> -> vector<2x8xf32>
    %c0_158 = arith.constant 0 : index
    %c0_159 = arith.constant 0 : index
    %424 = vector.load %arg6[%c0_158, %c0_159] : memref<1x8xf32, #tpu.memory_space<vmem>>, vector<1x8xf32>
    %425 = vector.broadcast %424 : vector<1x8xf32> to vector<2x8xf32>
    %426 = arith.addf %423, %425 : vector<2x8xf32>
    %c0_160 = arith.constant 0 : index
    %c0_161 = arith.constant 0 : index
    %427 = vector.load %arg8[%c0_160, %c0_161] : memref<2x8xf32, #tpu.memory_space<vmem>>, vector<2x8xf32>
    tpu.vector_store %arg8[%c0_160, %c0_161], %426 {strides = array<i32>} : memref<2x8xf32, #tpu.memory_space<vmem>>, vector<2x8xf32>,
    return
  }
  func.func @transform_0(%arg0: i32) -> (i32, i32, i32) {
    %c0_i32 = arith.constant 0 : i32
    %c0_i32_0 = arith.constant 0 : i32
    %c0_i32_1 = arith.constant 0 : i32
    %c0_i32_2 = arith.constant 0 : i32
    return %c0_i32, %c0_i32_0, %c0_i32_1 : i32, i32, i32
  }
  func.func @transform_1(%arg0: i32) -> (i32, i32, i32) {
    %c0_i32 = arith.constant 0 : i32
    %c0_i32_0 = arith.constant 0 : i32
    %c0_i32_1 = arith.constant 0 : i32
    %c0_i32_2 = arith.constant 0 : i32
    return %c0_i32, %c0_i32_0, %c0_i32_1 : i32, i32, i32
  }
  func.func @transform_2(%arg0: i32) -> (i32, i32, i32) {
    %c0_i32 = arith.constant 0 : i32
    %c0_i32_0 = arith.constant 0 : i32
    %c0_i32_1 = arith.constant 0 : i32
    %c0_i32_2 = arith.constant 0 : i32
    return %c0_i32, %c0_i32_0, %c0_i32_1 : i32, i32, i32
  }
  func.func @transform_3(%arg0: i32) -> (i32, i32, i32) {
    %c0_i32 = arith.constant 0 : i32
    %c0_i32_0 = arith.constant 0 : i32
    %c0_i32_1 = arith.constant 0 : i32
    %c0_i32_2 = arith.constant 0 : i32
    return %c0_i32, %c0_i32_0, %c0_i32_1 : i32, i32, i32
  }
  func.func @transform_4(%arg0: i32) -> (i32, i32) {
    %c0_i32 = arith.constant 0 : i32
    %c0_i32_0 = arith.constant 0 : i32
    %c0_i32_1 = arith.constant 0 : i32
    return %c0_i32, %c0_i32_0 : i32, i32
  }
  func.func @transform_5(%arg0: i32) -> (i32, i32) {
    %c0_i32 = arith.constant 0 : i32
    %c0_i32_0 = arith.constant 0 : i32
    %c0_i32_1 = arith.constant 0 : i32
    return %c0_i32, %c0_i32_0 : i32, i32
  }
  func.func @transform_6(%arg0: i32) -> (i32, i32, i32) {
    %c0_i32 = arith.constant 0 : i32
    %c0_i32_0 = arith.constant 0 : i32
    %c0_i32_1 = arith.constant 0 : i32
    %c0_i32_2 = arith.constant 0 : i32
    return %c0_i32, %c0_i32_0, %c0_i32_1 : i32, i32, i32
  }
  func.func @transform_7(%arg0: i32) -> (i32, i32) {
    %c0_i32 = arith.constant 0 : i32
    %c0_i32_0 = arith.constant 0 : i32
    %c0_i32_1 = arith.constant 0 : i32
    return %c0_i32, %c0_i32_0 : i32, i32
  }
}

</mosaic_0001>

<bundles_post_ra>
// kernel: tpu_custom_call.1
= control target key start
LH: loop header
LB: loop body
LE: loop exit
PB: predicated region body
PF: predicated region fallthrough
CT: control target
= control target key end

     0   :  { %13 = vsyncpa [#allocation3], 0  ;;  %s3309_s0 = inlined_call_operand.vmem [shape: f32[8,2,32], index: 0, kind: input, shape index: {}]   ;;  %s3310_s1 = inlined_call_operand.vmem [shape: f32[2,8,32], index: 1, kind: input, shape index: {}]   ;;  %s3311_s2 = inlined_call_operand.hbm [shape: f32[2,64,128], index: 2, kind: input, shape index: {}]   ;;  %s3312_s3 = inlined_call_operand.vmem [shape: f32[2,1,128], index: 3, kind: input, shape index: {}]   ;;  %s3313_s4 = inlined_call_operand.vmem [shape: f32[32,8], index: 4, kind: input, shape index: {}]   ;;  %s3314_s5 = inlined_call_operand.vmem [shape: f32[1,8], index: 5, kind: input, shape index: {}]   ;;  %s3315_s6 = inlined_call_operand.hbm [shape: f32[2,8,32], index: 6, kind: output, shape index: {0}]   ;;  %s3316_s7 = inlined_call_operand.hbm [shape: f32[2,8], index: 7, kind: output, shape index: {1}]  }
   0x1   :  { %14 = vsyncpa [#allocation4], 0 }
   0x2   :  { %15 = vsyncpa [#allocation7], 0  ;;  %s2660_s24 = smov [#allocation2]  }
   0x3   :  { %s25_s25 = sshll.u32 %s2660_s24, 4  ;;  %s26_s25 = int_to_ptr.vmem [resolvable:$true] %s25_s25 }
   0x4   :  { %s2602_s26 = scalar_lea.vmem %s26_s25, 2048  ;;  %p2607_p1 = scmp.lt.s32.totalorder %s26_s25, %s26_s25 }
   0x5   :  { %p2603_p0 = scmp.ne.s32.totalorder %s26_s25, %s2602_s26  ;;  %p2608_p2 = scmp.lt.s32.totalorder %s2602_s26, %s2602_s26 }
   0x7   :  { %p2609_p3 = por %p2608_p2, %p2607_p1 }
   0x9   :  { %p2610_p4 = pnand %p2609_p3, %p2603_p0 }
   0xb   :  { %2613 = shalt.err (!%p2610_p4)
}
   0xc   :  { %s2661_s27 = smov 128   ;;  %s2662_s28 = smov 8  }
   0xd   :  { %31 = dma.hbm_to_vmem [thread:$0]  %s3311_s2, 2048, %s26_s25, [#allocation3], %s2661_s27, %s2661_s27, %s2662_s28  }
   0xe   :  { %2654 = dma.done.wait [#allocation3], 2048  }
   0xf   :  { %2655 = vsyncadd [#allocation3], 4294965248  ;;  %v2663_v0 = vmov 0.0   ;;  %vm2664_vm0 = vmmov 0   ;;  %v2721_v1 = vld [vmem:[#allocation2 + $0x38] sm:$0xff]  ;;  %v2723_v2 = vld [vmem:[#allocation2 + $0x30] sm:$0xff]  ;;  %v86_v18 = vlaneseq }
  0x10   :  { %2116 = vmatprep.subr.mxu0 %v2663_v0  ;;  %2132 = vmatprep.mubr.msk.f32.mxu0 %vm2664_vm0, %v2663_v0  ;;  %v2727_v3 = vld [vmem:[#allocation2 + $0x28] sm:$0xff]  ;;  %v2731_v4 = vld [vmem:[#allocation2 + $0x20] sm:$0xff]  ;;  %v2735_v5 = vld [vmem:[#allocation2 + $0x18] sm:$0xff]  ;;  %vm43_vm1 = vcmask 261120   ;;  %vm108_vm2 = vcmask 523264   ;;  %s2665_s11 = smov 64  }
  0x11   :  { %2135 = vmatprep.subr.mxu1 %v2663_v0  ;;  %2151 = vmatprep.mubr.msk.f32.mxu1 %vm2664_vm0, %v2663_v0  ;;  %v2739_v6 = vld [vmem:[#allocation2 + $0x10] sm:$0xff]  ;;  %v2743_v7 = vld [vmem:[#allocation2 + $0x8] sm:$0xff]  ;;  %v91_v8 = vld [vmem:[%s3309_s0] sm:$0x3]  ;;  %v87_v19 = vand.u32 127, %v86_v18  ;;  %s2666_s12 = smov 32  }
  0x12   :  { %2117 = vmatpush3.msra.mxu0 %v2721_v1  ;;  %v2750_v9 = vld [vmem:[#allocation2] sm:$0xff]  ;;  %v92_v10 = vsel %vm43_vm1, %v91_v8, 0.0  ;;  %v2793_v29 = vld [vmem:[#allocation2 + $0x78] sm:$0xff]  ;;  %v2795_v30 = vld [vmem:[#allocation2 + $0x70] sm:$0xff] }
  0x13   :  { %2118 = vmatprep.subr.mxu0 %v2663_v0  ;;  %v2779_v11 = vld [vmem:[%s3312_s3] ss:$0 sm:$0xff]  ;;  %vm88_vm3 = vcmp.ge.s32.totalorder %v87_v19, 64  ;;  %vm89_vm4 = vcmp.lt.s32.totalorder %v87_v19, 96  ;;  %2136 = vmatpush3.msra.mxu1 %v2793_v29  ;;  %v2799_v31 = vld [vmem:[#allocation2 + $0x68] sm:$0xff]  ;;  %v2807_v33 = vld [vmem:[#allocation2 + $0x58] sm:$0xff] }
  0x14   :  { %2119 = vmatpush3.msra.mxu0 %v2723_v2  ;;  %vm2782_vm5 = vmand %vm88_vm3, %vm89_vm4  ;;  %2137 = vmatprep.subr.mxu1 %v2663_v0  ;;  %v2803_v32 = vld [vmem:[#allocation2 + $0x60] sm:$0xff]  ;;  %v2811_v34 = vld [vmem:[#allocation2 + $0x50] sm:$0xff] }
  0x15   :  { %2120 = vmatprep.subr.mxu0 %v2663_v0  ;;  %2138 = vmatpush3.msra.mxu1 %v2795_v30  ;;  %v2815_v36 = vld [vmem:[#allocation2 + $0x48] sm:$0xff]  ;;  %v2822_v37 = vld [vmem:[#allocation2 + $0x40] sm:$0xff] }
  0x16   :  { %2121 = vmatpush3.msra.mxu0 %v2727_v3  ;;  %2139 = vmatprep.subr.mxu1 %v2663_v0  ;;  %v1930_v40 = vld [vmem:[%s3309_s0 + $0x2] sm:$0x3]  ;;  %v2874_v45 = vld [vmem:[%s3312_s3 + $0x1] ss:$0 sm:$0xff]  ;;  %v1805_v20 = vld [vmem:[%s3313_s4 + $0x8] sm:$0xff] }
  0x17   :  { %2122 = vmatprep.subr.mxu0 %v2663_v0  ;;  %2140 = vmatpush3.msra.mxu1 %v2799_v31 }
  0x18   :  { %2123 = vmatpush3.msra.mxu0 %v2731_v4  ;;  %2141 = vmatprep.subr.mxu1 %v2663_v0 }
  0x19   :  { %2124 = vmatprep.subr.mxu0 %v2663_v0  ;;  %2142 = vmatpush3.msra.mxu1 %v2803_v32 }
  0x1a   :  { %2125 = vmatpush3.msra.mxu0 %v2735_v5  ;;  %2143 = vmatprep.subr.mxu1 %v2663_v0 }
  0x1b   :  { %2126 = vmatprep.subr.mxu0 %v2663_v0  ;;  %2144 = vmatpush3.msra.mxu1 %v2807_v33 }
  0x1c   :  { %2127 = vmatpush3.msra.mxu0 %v2739_v6  ;;  %2145 = vmatprep.subr.mxu1 %v2663_v0 }
  0x1d   :  { %2128 = vmatprep.subr.mxu0 %v2663_v0  ;;  %2146 = vmatpush3.msra.mxu1 %v2811_v34 }
  0x1e   :  { %2129 = vmatpush3.msra.mxu0 %v2743_v7  ;;  %2147 = vmatprep.subr.mxu1 %v2663_v0 }
  0x1f   :  { %2130 = vmatprep.subr.mxu0 %v2663_v0  ;;  %2148 = vmatpush3.msra.mxu1 %v2815_v36 }
  0x20   :  { %2131 = vmatpush3.msra.mxu0 %v2750_v9  ;;  %2149 = vmatprep.subr.mxu1 %v2663_v0 }
  0x21   :  { %2133 = vmatmul.mubr.msk.f32.vlgmr.msra.gmra.mxu0 %vm108_vm2, %v92_v10  ;;  %2154 = vmatprep.subr.mxu0 %v2663_v0 }
  0x22   :  { %2155 = vmatpush3.msra.mxu0 %v2721_v1  ;;  %2170 = vmatprep.mubr.msk.f32.mxu0 %vm2664_vm0, %v2663_v0 }
  0x23   :  { %2156 = vmatprep.subr.mxu0 %v2663_v0  ;;  %2150 = vmatpush3.msra.mxu1 %v2822_v37 }
  0x24   :  { %2157 = vmatpush3.msra.mxu0 %v2723_v2  ;;  %2173 = vmatprep.subr.mxu1 %v2663_v0 }
  0x25   :  { %2158 = vmatprep.subr.mxu0 %v2663_v0 }
  0x26   :  { %2159 = vmatpush3.msra.mxu0 %v2727_v3 }
  0x27   :  { %2160 = vmatprep.subr.mxu0 %v2663_v0 }
  0x28   :  { %2161 = vmatpush3.msra.mxu0 %v2731_v4 }
  0x29   :  { %2162 = vmatprep.subr.mxu0 %v2663_v0 }
  0x2a   :  { %2163 = vmatpush3.msra.mxu0 %v2735_v5 }
  0x2b   :  { %2164 = vmatprep.subr.mxu0 %v2663_v0 }
  0x2c   :  { %2165 = vmatpush3.msra.mxu0 %v2739_v6 }
  0x2d   :  { %2166 = vmatprep.subr.mxu0 %v2663_v0 }
  0x2e   :  { %2167 = vmatpush3.msra.mxu0 %v2743_v7 }
  0x2f   :  { %2168 = vmatprep.subr.mxu0 %v2663_v0 }
  0x30   :  { %2169 = vmatpush3.msra.mxu0 %v2750_v9 }
  0x31   :  { %2192 = vmatprep.subr.mxu0 %v2663_v0 }
  0xe1   :  { %v178_v12 = vpop.f32.mrf.mxu0 }
  0xe2   :  { %v179_v13 = vadd.f32 %v2779_v11, %v178_v12 }
  0xe3   :  { %v2134_v14 = vpop.f32.mrf.mxu0 }
  0xe4   :  { %v1925_v15 = vmul.f32 -1.442695, %v179_v13 }
  0xe6   :  { %2440 = vpow2.f32 %v1925_v15 }
  0xe7   :  { %2442 = vtanh.f32 %v179_v13 }
  0xf3   :  { %v2441_v16 = vpop.eup %2440 }
  0xf4   :  { %v186_v17 = vadd.f32 1.0, %v2441_v16  ;;  %v2443_v21 = vpop.eup %2442 }
  0xf6   :  { %2444 = vrcp.f32 %v186_v17 }
 0x103   :  { %v2445_v22 = vpop.eup %2444 }
 0x104   :  { %v189_v23 = vsel %vm2782_vm5, %v2443_v21, %v2445_v22 }
 0x105   :  { %192 = vrot.lane.b32.xlu0 %v189_v23, %s2665_s11  ;;  %v190_v26 = vmul.f32 0.0, %v189_v23 }
 0x177   :  { %v193_v24 = vpop.permute.xlu0 %192 }
 0x178   :  { %v195_v25 = vmul.f32 %v193_v24, %v189_v23 }
 0x17a   :  { %197 = vrot.lane.b32.xlu0 %v195_v25, %s2666_s12 }
 0x1ec   :  { %v198_v27 = vpop.permute.xlu0 %197 }
 0x1ed   :  { %v2790_v28 = vadd.f32 %v198_v27, %v190_v26 }
 0x1ef   :  { %2446 = vtanh.f32 %v2790_v28 }
 0x1fc   :  { %v2447_v35 = vpop.eup %2446 }
 0x1fd   :  { %203 = vrot.lane.b32.xlu1 %v2447_v35, %s2665_s11 }
 0x26f   :  { %v204_v38 = vpop.permute.xlu1 %203 }
 0x270   :  { %v206_v39 = vmul.f32 %v204_v38, %v189_v23  ;;  %v1935_v38 = vld [vmem:[%s3309_s0 + $0x4] sm:$0x3] }
 0x272   :  { %329 = vrot.lane.b32.xlu0 %v206_v39, %s2665_s11  ;;  %208 = vrot.lane.b32.xlu1 %v206_v39, %s2666_s12 }
 0x2e4   :  { %v330_v41 = vpop.permute.xlu0 %329  ;;  %v209_v42 = vpop.permute.xlu1 %208 }
 0x2e5   :  { %v332_v43 = vsel %vm43_vm1, %v1930_v40, %v330_v41  ;;  %v211_v44 = vsel %vm43_vm1, %v209_v42, 0.0 }
 0x2e6   :  { %2152 = vmatmul.mubr.msk.f32.vlgmr.msra.gmra.mxu1 %vm108_vm2, %v211_v44  ;;  %2171 = vmatmul.mubr.msk.f32.vlgmr.msra.gmra.mxu0 %vm108_vm2, %v332_v43 }
 0x2e7   :  { %2174 = vmatpush3.msra.mxu1 %v2793_v29  ;;  %2193 = vmatpush3.msra.mxu0 %v2721_v1 }
 0x2e8   :  { %2175 = vmatprep.subr.mxu1 %v2663_v0  ;;  %2194 = vmatprep.subr.mxu0 %v2663_v0 }
 0x2e9   :  { %2176 = vmatpush3.msra.mxu1 %v2795_v30  ;;  %2195 = vmatpush3.msra.mxu0 %v2723_v2 }
 0x2ea   :  { %2177 = vmatprep.subr.mxu1 %v2663_v0  ;;  %2196 = vmatprep.subr.mxu0 %v2663_v0 }
 0x2eb   :  { %2178 = vmatpush3.msra.mxu1 %v2799_v31  ;;  %2197 = vmatpush3.msra.mxu0 %v2727_v3 }
 0x2ec   :  { %2179 = vmatprep.subr.mxu1 %v2663_v0  ;;  %2198 = vmatprep.subr.mxu0 %v2663_v0 }
 0x2ed   :  { %2180 = vmatpush3.msra.mxu1 %v2803_v32  ;;  %2199 = vmatpush3.msra.mxu0 %v2731_v4 }
 0x2ee   :  { %2181 = vmatprep.subr.mxu1 %v2663_v0  ;;  %2200 = vmatprep.subr.mxu0 %v2663_v0 }
 0x2ef   :  { %2182 = vmatpush3.msra.mxu1 %v2807_v33  ;;  %2201 = vmatpush3.msra.mxu0 %v2735_v5 }
 0x2f0   :  { %2183 = vmatprep.subr.mxu1 %v2663_v0  ;;  %2202 = vmatprep.subr.mxu0 %v2663_v0 }
 0x2f1   :  { %2184 = vmatpush3.msra.mxu1 %v2811_v34  ;;  %2189 = vmatprep.mubr.msk.f32.mxu1 %vm2664_vm0, %v2663_v0 }
 0x2f2   :  { %2185 = vmatprep.subr.mxu1 %v2663_v0  ;;  %2203 = vmatpush3.msra.mxu0 %v2739_v6 }
 0x2f3   :  { %2186 = vmatpush3.msra.mxu1 %v2815_v36  ;;  %2204 = vmatprep.subr.mxu0 %v2663_v0 }
 0x2f4   :  { %2187 = vmatprep.subr.mxu1 %v2663_v0  ;;  %2205 = vmatpush3.msra.mxu0 %v2743_v7 }
 0x2f5   :  { %2188 = vmatpush3.msra.mxu1 %v2822_v37  ;;  %2206 = vmatprep.subr.mxu0 %v2663_v0 }
 0x2f6   :  { %2207 = vmatpush3.msra.mxu0 %v2750_v9  ;;  %2208 = vmatprep.mubr.msk.f32.mxu0 %vm2664_vm0, %v2663_v0 }
 0x2f7   :  { %2211 = vmatprep.subr.mxu1 %v2663_v0  ;;  %2230 = vmatprep.subr.mxu0 %v2663_v0 }
 0x3a6   :  { %v298_v46 = vpop.f32.mrf.mxu1  ;;  %v402_v47 = vpop.f32.mrf.mxu0 }
 0x3a7   :  { %v299_v48 = vadd.f32 %v2874_v45, %v298_v46  ;;  %v403_v49 = vadd.f32 %v2779_v11, %v402_v47 }
 0x3a8   :  { %v2153_v50 = vpop.f32.mrf.mxu1  ;;  %v2172_v51 = vpop.f32.mrf.mxu0 }
 0x3a9   :  { %v1929_v52 = vmul.f32 -1.442695, %v299_v48  ;;  %v1932_v53 = vmul.f32 -1.442695, %v403_v49 }
 0x3ab   :  { %2448 = vpow2.f32 %v1929_v52 }
 0x3ac   :  { %2450 = vpow2.f32 %v1932_v53 }
 0x3ad   :  { %2452 = vtanh.f32 %v299_v48 }
 0x3ae   :  { %2454 = vtanh.f32 %v403_v49 }
 0x3b8   :  { %v2449_v54 = vpop.eup %2448 }
 0x3b9   :  { %v2451_v55 = vpop.eup %2450  ;;  %v306_v56 = vadd.f32 1.0, %v2449_v54 }
 0x3ba   :  { %v410_v57 = vadd.f32 1.0, %v2451_v55  ;;  %v2453_v58 = vpop.eup %2452 }
 0x3bb   :  { %2456 = vrcp.f32 %v306_v56  ;;  %v2455_v59 = vpop.eup %2454 }
 0x3bc   :  { %2458 = vrcp.f32 %v410_v57 }
 0x3c8   :  { %v2457_v60 = vpop.eup %2456 }
 0x3c9   :  { %v2459_v61 = vpop.eup %2458  ;;  %v309_v62 = vsel %vm2782_vm5, %v2453_v58, %v2457_v60 }
 0x3ca   :  { %312 = vrot.lane.b32.xlu1 %v309_v62, %s2665_s11  ;;  %v413_v63 = vsel %vm2782_vm5, %v2455_v59, %v2459_v61  ;;  %v310_v14 = vmul.f32 0.0, %v309_v62 }
 0x3cb   :  { %416 = vrot.lane.b32.xlu0 %v413_v63, %s2665_s11  ;;  %v414_v16 = vmul.f32 %v413_v63, %v2790_v28 }
 0x43c   :  { %v313_v8 = vpop.permute.xlu1 %312 }
 0x43d   :  { %v315_v10 = vmul.f32 %v313_v8, %v309_v62  ;;  %v417_v12 = vpop.permute.xlu0 %416 }
 0x43e   :  { %v419_v13 = vmul.f32 %v417_v12, %v413_v63 }
 0x43f   :  { %317 = vrot.lane.b32.xlu1 %v315_v10, %s2666_s12 }
 0x440   :  { %421 = vrot.lane.b32.xlu0 %v419_v13, %s2666_s12 }
 0x4b1   :  { %v318_v15 = vpop.permute.xlu1 %317 }
 0x4b2   :  { %v2887_v17 = vadd.f32 %v318_v15, %v310_v14  ;;  %v422_v18 = vpop.permute.xlu0 %421 }
 0x4b3   :  { %v2889_v19 = vadd.f32 %v422_v18, %v414_v16 }
 0x4b4   :  { %2460 = vtanh.f32 %v2887_v17 }
 0x4b5   :  { %2462 = vtanh.f32 %v2889_v19 }
 0x4c1   :  { %v2461_v21 = vpop.eup %2460 }
 0x4c2   :  { %v2463_v22 = vpop.eup %2462  ;;  %323 = vrot.lane.b32.xlu1 %v2461_v21, %s2665_s11 }
 0x4c3   :  { %427 = vrot.lane.b32.xlu0 %v2463_v22, %s2665_s11 }
 0x534   :  { %v324_v23 = vpop.permute.xlu1 %323 }
 0x535   :  { %v326_v24 = vmul.f32 %v324_v23, %v309_v62  ;;  %v428_v25 = vpop.permute.xlu0 %427 }
 0x536   :  { %v430_v26 = vmul.f32 %v428_v25, %v413_v63 }
 0x537   :  { %436 = vrot.lane.b32.xlu0 %v326_v24, %s2665_s11 }
 0x538   :  { %432 = vrot.lane.b32.xlu1 %v430_v26, %s2666_s12 }
 0x53c   :  { %540 = vrot.lane.b32.xlu1 %v430_v26, %s2665_s11  ;;  %v1940_v26 = vld [vmem:[%s3309_s0 + $0x6] sm:$0x3] }
 0x5a9   :  { %v437_v27 = vpop.permute.xlu0 %436 }
 0x5aa   :  { %v433_v28 = vpop.permute.xlu1 %432 }
 0x5ab   :  { %v439_v35 = vsel %vm43_vm1, %v433_v28, %v437_v27 }
 0x5ac   :  { %2190 = vmatmul.mubr.msk.f32.vlgmr.msra.gmra.mxu1 %vm108_vm2, %v439_v35 }
 0x5ad   :  { %2212 = vmatpush3.msra.mxu1 %v2793_v29  ;;  %2227 = vmatprep.mubr.msk.f32.mxu1 %vm2664_vm0, %v2663_v0 }
 0x5ae   :  { %v541_v39 = vpop.permute.xlu1 %540  ;;  %2213 = vmatprep.subr.mxu1 %v2663_v0 }
 0x5af   :  { %v543_v40 = vsel %vm43_vm1, %v1935_v38, %v541_v39  ;;  %2214 = vmatpush3.msra.mxu1 %v2795_v30 }
 0x5b0   :  { %2209 = vmatmul.mubr.msk.f32.vlgmr.msra.gmra.mxu0 %vm108_vm2, %v543_v40  ;;  %2215 = vmatprep.subr.mxu1 %v2663_v0 }
 0x5b1   :  { %2216 = vmatpush3.msra.mxu1 %v2799_v31  ;;  %2231 = vmatpush3.msra.mxu0 %v2721_v1 }
 0x5b2   :  { %2217 = vmatprep.subr.mxu1 %v2663_v0  ;;  %2232 = vmatprep.subr.mxu0 %v2663_v0 }
 0x5b3   :  { %2218 = vmatpush3.msra.mxu1 %v2803_v32  ;;  %2233 = vmatpush3.msra.mxu0 %v2723_v2 }
 0x5b4   :  { %2219 = vmatprep.subr.mxu1 %v2663_v0  ;;  %2234 = vmatprep.subr.mxu0 %v2663_v0 }
 0x5b5   :  { %2220 = vmatpush3.msra.mxu1 %v2807_v33  ;;  %2235 = vmatpush3.msra.mxu0 %v2727_v3 }
 0x5b6   :  { %2221 = vmatprep.subr.mxu1 %v2663_v0  ;;  %2236 = vmatprep.subr.mxu0 %v2663_v0 }
 0x5b7   :  { %2222 = vmatpush3.msra.mxu1 %v2811_v34  ;;  %2237 = vmatpush3.msra.mxu0 %v2731_v4 }
 0x5b8   :  { %2223 = vmatprep.subr.mxu1 %v2663_v0  ;;  %2238 = vmatprep.subr.mxu0 %v2663_v0 }
 0x5b9   :  { %2224 = vmatpush3.msra.mxu1 %v2815_v36  ;;  %2239 = vmatpush3.msra.mxu0 %v2735_v5 }
 0x5ba   :  { %2225 = vmatprep.subr.mxu1 %v2663_v0  ;;  %2240 = vmatprep.subr.mxu0 %v2663_v0 }
 0x5bb   :  { %2226 = vmatpush3.msra.mxu1 %v2822_v37  ;;  %2241 = vmatpush3.msra.mxu0 %v2739_v6 }
 0x5bc   :  { %2242 = vmatprep.subr.mxu0 %v2663_v0  ;;  %2246 = vmatprep.mubr.msk.f32.mxu0 %vm2664_vm0, %v2663_v0 }
 0x5bd   :  { %2243 = vmatpush3.msra.mxu0 %v2743_v7  ;;  %2249 = vmatprep.subr.mxu1 %v2663_v0 }
 0x5be   :  { %2244 = vmatprep.subr.mxu0 %v2663_v0 }
 0x5bf   :  { %2245 = vmatpush3.msra.mxu0 %v2750_v9 }
 0x5c0   :  { %2268 = vmatprep.subr.mxu0 %v2663_v0 }
 0x66c   :  { %v509_v41 = vpop.f32.mrf.mxu1 }
 0x66d   :  { %v510_v42 = vadd.f32 %v2874_v45, %v509_v41 }
 0x66e   :  { %v2191_v43 = vpop.f32.mrf.mxu1 }
 0x66f   :  { %v1934_v44 = vmul.f32 -1.442695, %v510_v42 }
 0x670   :  { %v613_v46 = vpop.f32.mrf.mxu0 }
 0x671   :  { %2464 = vpow2.f32 %v1934_v44  ;;  %v614_v47 = vadd.f32 %v2779_v11, %v613_v46 }
 0x672   :  { %v2210_v48 = vpop.f32.mrf.mxu0 }
 0x673   :  { %v1937_v49 = vmul.f32 -1.442695, %v614_v47 }
 0x675   :  { %2466 = vpow2.f32 %v1937_v49 }
 0x676   :  { %2468 = vtanh.f32 %v510_v42 }
 0x67e   :  { %v2465_v50 = vpop.eup %2464 }
 0x67f   :  { %v517_v51 = vadd.f32 1.0, %v2465_v50 }
 0x681   :  { %2470 = vrcp.f32 %v517_v51 }
 0x682   :  { %v2467_v52 = vpop.eup %2466  ;;  %2472 = vtanh.f32 %v614_v47 }
 0x683   :  { %v621_v53 = vadd.f32 1.0, %v2467_v52  ;;  %v2469_v54 = vpop.eup %2468 }
 0x685   :  { %2474 = vrcp.f32 %v621_v53 }
 0x68e   :  { %v2471_v55 = vpop.eup %2470 }
 0x68f   :  { %v520_v56 = vsel %vm2782_vm5, %v2469_v54, %v2471_v55  ;;  %v2473_v57 = vpop.eup %2472 }
 0x690   :  { %523 = vrot.lane.b32.xlu0 %v520_v56, %s2665_s11  ;;  %v521_v8 = vmul.f32 %v520_v56, %v2887_v17 }
 0x692   :  { %v2475_v58 = vpop.eup %2474 }
 0x693   :  { %v624_v59 = vsel %vm2782_vm5, %v2473_v57, %v2475_v58 }
 0x694   :  { %627 = vrot.lane.b32.xlu1 %v624_v59, %s2665_s11  ;;  %v625_v13 = vmul.f32 %v624_v59, %v2889_v19 }
 0x702   :  { %v524_v60 = vpop.permute.xlu0 %523 }
 0x703   :  { %v526_v61 = vmul.f32 %v524_v60, %v520_v56 }
 0x705   :  { %528 = vrot.lane.b32.xlu0 %v526_v61, %s2666_s12 }
 0x706   :  { %v628_v62 = vpop.permute.xlu1 %627 }
 0x707   :  { %v630_v63 = vmul.f32 %v628_v62, %v624_v59 }
 0x709   :  { %632 = vrot.lane.b32.xlu1 %v630_v63, %s2666_s12 }
 0x777   :  { %v529_v10 = vpop.permute.xlu0 %528 }
 0x778   :  { %v2952_v12 = vadd.f32 %v529_v10, %v521_v8 }
 0x77a   :  { %2476 = vtanh.f32 %v2952_v12 }
 0x77b   :  { %v633_v14 = vpop.permute.xlu1 %632 }
 0x77c   :  { %v2956_v15 = vadd.f32 %v633_v14, %v625_v13 }
 0x77e   :  { %2478 = vtanh.f32 %v2956_v15 }
 0x787   :  { %v2477_v16 = vpop.eup %2476 }
 0x788   :  { %534 = vrot.lane.b32.xlu0 %v2477_v16, %s2665_s11 }
 0x78b   :  { %v2479_v18 = vpop.eup %2478 }
 0x78c   :  { %638 = vrot.lane.b32.xlu1 %v2479_v18, %s2665_s11 }
 0x7fa   :  { %v535_v21 = vpop.permute.xlu0 %534 }
 0x7fb   :  { %v537_v17 = vmul.f32 %v535_v21, %v520_v56 }
 0x7fd   :  { %647 = vrot.lane.b32.xlu1 %v537_v17, %s2665_s11 }
 0x7fe   :  { %v639_v22 = vpop.permute.xlu1 %638 }
 0x7ff   :  { %v641_v23 = vmul.f32 %v639_v22, %v624_v59 }
 0x801   :  { %643 = vrot.lane.b32.xlu0 %v641_v23, %s2666_s12 }
 0x805   :  { %751 = vrot.lane.b32.xlu0 %v641_v23, %s2665_s11  ;;  %v1945_v23 = vld [vmem:[%s3309_s0 + $0x8] sm:$0x3] }
 0x86f   :  { %v648_v19 = vpop.permute.xlu1 %647 }
 0x873   :  { %v644_v24 = vpop.permute.xlu0 %643 }
 0x874   :  { %v650_v25 = vsel %vm43_vm1, %v644_v24, %v648_v19 }
 0x875   :  { %2228 = vmatmul.mubr.msk.f32.vlgmr.msra.gmra.mxu1 %vm108_vm2, %v650_v25 }
 0x876   :  { %2250 = vmatpush3.msra.mxu1 %v2793_v29  ;;  %2265 = vmatprep.mubr.msk.f32.mxu1 %vm2664_vm0, %v2663_v0 }
 0x877   :  { %v752_v27 = vpop.permute.xlu0 %751  ;;  %2251 = vmatprep.subr.mxu1 %v2663_v0 }
 0x878   :  { %v754_v28 = vsel %vm43_vm1, %v1940_v26, %v752_v27  ;;  %2252 = vmatpush3.msra.mxu1 %v2795_v30 }
 0x879   :  { %2247 = vmatmul.mubr.msk.f32.vlgmr.msra.gmra.mxu0 %vm108_vm2, %v754_v28  ;;  %2253 = vmatprep.subr.mxu1 %v2663_v0 }
 0x87a   :  { %2254 = vmatpush3.msra.mxu1 %v2799_v31  ;;  %2269 = vmatpush3.msra.mxu0 %v2721_v1 }
 0x87b   :  { %2255 = vmatprep.subr.mxu1 %v2663_v0  ;;  %2270 = vmatprep.subr.mxu0 %v2663_v0 }
 0x87c   :  { %2256 = vmatpush3.msra.mxu1 %v2803_v32  ;;  %2271 = vmatpush3.msra.mxu0 %v2723_v2 }
 0x87d   :  { %2257 = vmatprep.subr.mxu1 %v2663_v0  ;;  %2272 = vmatprep.subr.mxu0 %v2663_v0 }
 0x87e   :  { %2258 = vmatpush3.msra.mxu1 %v2807_v33  ;;  %2273 = vmatpush3.msra.mxu0 %v2727_v3 }
 0x87f   :  { %2259 = vmatprep.subr.mxu1 %v2663_v0  ;;  %2274 = vmatprep.subr.mxu0 %v2663_v0 }
 0x880   :  { %2260 = vmatpush3.msra.mxu1 %v2811_v34  ;;  %2275 = vmatpush3.msra.mxu0 %v2731_v4 }
 0x881   :  { %2261 = vmatprep.subr.mxu1 %v2663_v0  ;;  %2276 = vmatprep.subr.mxu0 %v2663_v0 }
 0x882   :  { %2262 = vmatpush3.msra.mxu1 %v2815_v36  ;;  %2277 = vmatpush3.msra.mxu0 %v2735_v5 }
 0x883   :  { %2263 = vmatprep.subr.mxu1 %v2663_v0  ;;  %2278 = vmatprep.subr.mxu0 %v2663_v0 }
 0x884   :  { %2264 = vmatpush3.msra.mxu1 %v2822_v37  ;;  %2279 = vmatpush3.msra.mxu0 %v2739_v6 }
 0x885   :  { %2280 = vmatprep.subr.mxu0 %v2663_v0  ;;  %2284 = vmatprep.mubr.msk.f32.mxu0 %vm2664_vm0, %v2663_v0 }
 0x886   :  { %2281 = vmatpush3.msra.mxu0 %v2743_v7  ;;  %2287 = vmatprep.subr.mxu1 %v2663_v0 }
 0x887   :  { %2282 = vmatprep.subr.mxu0 %v2663_v0 }
 0x888   :  { %2283 = vmatpush3.msra.mxu0 %v2750_v9 }
 0x889   :  { %2306 = vmatprep.subr.mxu0 %v2663_v0 }
 0x935   :  { %v720_v35 = vpop.f32.mrf.mxu1 }
 0x936   :  { %v721_v38 = vadd.f32 %v2874_v45, %v720_v35 }
 0x937   :  { %v2229_v39 = vpop.f32.mrf.mxu1 }
 0x938   :  { %v1939_v40 = vmul.f32 -1.442695, %v721_v38 }
 0x939   :  { %v824_v41 = vpop.f32.mrf.mxu0 }
 0x93a   :  { %2480 = vpow2.f32 %v1939_v40  ;;  %v825_v42 = vadd.f32 %v2779_v11, %v824_v41 }
 0x93b   :  { %v2248_v43 = vpop.f32.mrf.mxu0 }
 0x93c   :  { %v1942_v44 = vmul.f32 -1.442695, %v825_v42 }
 0x93e   :  { %2482 = vpow2.f32 %v1942_v44 }
 0x93f   :  { %2484 = vtanh.f32 %v721_v38 }
 0x947   :  { %v2481_v46 = vpop.eup %2480 }
 0x948   :  { %v728_v47 = vadd.f32 1.0, %v2481_v46 }
 0x94a   :  { %2486 = vrcp.f32 %v728_v47 }
 0x94b   :  { %v2483_v48 = vpop.eup %2482  ;;  %2488 = vtanh.f32 %v825_v42 }
 0x94c   :  { %v832_v49 = vadd.f32 1.0, %v2483_v48  ;;  %v2485_v50 = vpop.eup %2484 }
 0x94e   :  { %2490 = vrcp.f32 %v832_v49 }
 0x957   :  { %v2487_v51 = vpop.eup %2486 }
 0x958   :  { %v731_v52 = vsel %vm2782_vm5, %v2485_v50, %v2487_v51  ;;  %v2489_v53 = vpop.eup %2488 }
 0x959   :  { %734 = vrot.lane.b32.xlu1 %v731_v52, %s2665_s11  ;;  %v732_v60 = vmul.f32 %v731_v52, %v2952_v12 }
 0x95b   :  { %v2491_v54 = vpop.eup %2490 }
 0x95c   :  { %v835_v55 = vsel %vm2782_vm5, %v2489_v53, %v2491_v54 }
 0x95d   :  { %838 = vrot.lane.b32.xlu0 %v835_v55, %s2665_s11  ;;  %v836_v63 = vmul.f32 %v835_v55, %v2956_v15 }
 0x9cb   :  { %v735_v56 = vpop.permute.xlu1 %734 }
 0x9cc   :  { %v737_v57 = vmul.f32 %v735_v56, %v731_v52 }
 0x9ce   :  { %739 = vrot.lane.b32.xlu1 %v737_v57, %s2666_s12 }
 0x9cf   :  { %v839_v58 = vpop.permute.xlu0 %838 }
 0x9d0   :  { %v841_v59 = vmul.f32 %v839_v58, %v835_v55 }
 0x9d2   :  { %843 = vrot.lane.b32.xlu0 %v841_v59, %s2666_s12 }
 0xa40   :  { %v740_v61 = vpop.permute.xlu1 %739 }
 0xa41   :  { %v3018_v62 = vadd.f32 %v740_v61, %v732_v60 }
 0xa43   :  { %2492 = vtanh.f32 %v3018_v62 }
 0xa44   :  { %v844_v8 = vpop.permute.xlu0 %843 }
 0xa45   :  { %v3022_v10 = vadd.f32 %v844_v8, %v836_v63 }
 0xa47   :  { %2494 = vtanh.f32 %v3022_v10 }
 0xa50   :  { %v2493_v13 = vpop.eup %2492 }
 0xa51   :  { %745 = vrot.lane.b32.xlu1 %v2493_v13, %s2665_s11 }
 0xa54   :  { %v2495_v14 = vpop.eup %2494 }
 0xa55   :  { %849 = vrot.lane.b32.xlu0 %v2495_v14, %s2665_s11 }
 0xac3   :  { %v746_v16 = vpop.permute.xlu1 %745 }
 0xac4   :  { %v748_v12 = vmul.f32 %v746_v16, %v731_v52 }
 0xac6   :  { %858 = vrot.lane.b32.xlu0 %v748_v12, %s2665_s11 }
 0xac7   :  { %v850_v18 = vpop.permute.xlu0 %849 }
 0xac8   :  { %v852_v21 = vmul.f32 %v850_v18, %v835_v55 }
 0xaca   :  { %854 = vrot.lane.b32.xlu1 %v852_v21, %s2666_s12 }
 0xace   :  { %962 = vrot.lane.b32.xlu1 %v852_v21, %s2665_s11  ;;  %v1950_v21 = vld [vmem:[%s3309_s0 + $0xa] sm:$0x3] }
 0xb38   :  { %v859_v15 = vpop.permute.xlu0 %858 }
 0xb3c   :  { %v855_v17 = vpop.permute.xlu1 %854 }
 0xb3d   :  { %v861_v22 = vsel %vm43_vm1, %v855_v17, %v859_v15 }
 0xb3e   :  { %2266 = vmatmul.mubr.msk.f32.vlgmr.msra.gmra.mxu1 %vm108_vm2, %v861_v22 }
 0xb3f   :  { %2288 = vmatpush3.msra.mxu1 %v2793_v29  ;;  %2303 = vmatprep.mubr.msk.f32.mxu1 %vm2664_vm0, %v2663_v0 }
 0xb40   :  { %v963_v19 = vpop.permute.xlu1 %962  ;;  %2289 = vmatprep.subr.mxu1 %v2663_v0 }
 0xb41   :  { %v965_v24 = vsel %vm43_vm1, %v1945_v23, %v963_v19  ;;  %2290 = vmatpush3.msra.mxu1 %v2795_v30 }
 0xb42   :  { %2285 = vmatmul.mubr.msk.f32.vlgmr.msra.gmra.mxu0 %vm108_vm2, %v965_v24  ;;  %2291 = vmatprep.subr.mxu1 %v2663_v0 }
 0xb43   :  { %2292 = vmatpush3.msra.mxu1 %v2799_v31  ;;  %2307 = vmatpush3.msra.mxu0 %v2721_v1 }
 0xb44   :  { %2293 = vmatprep.subr.mxu1 %v2663_v0  ;;  %2308 = vmatprep.subr.mxu0 %v2663_v0 }
 0xb45   :  { %2294 = vmatpush3.msra.mxu1 %v2803_v32  ;;  %2309 = vmatpush3.msra.mxu0 %v2723_v2 }
 0xb46   :  { %2295 = vmatprep.subr.mxu1 %v2663_v0  ;;  %2310 = vmatprep.subr.mxu0 %v2663_v0 }
 0xb47   :  { %2296 = vmatpush3.msra.mxu1 %v2807_v33  ;;  %2311 = vmatpush3.msra.mxu0 %v2727_v3 }
 0xb48   :  { %2297 = vmatprep.subr.mxu1 %v2663_v0  ;;  %2312 = vmatprep.subr.mxu0 %v2663_v0 }
 0xb49   :  { %2298 = vmatpush3.msra.mxu1 %v2811_v34  ;;  %2313 = vmatpush3.msra.mxu0 %v2731_v4 }
 0xb4a   :  { %2299 = vmatprep.subr.mxu1 %v2663_v0  ;;  %2314 = vmatprep.subr.mxu0 %v2663_v0 }
 0xb4b   :  { %2300 = vmatpush3.msra.mxu1 %v2815_v36  ;;  %2315 = vmatpush3.msra.mxu0 %v2735_v5 }
 0xb4c   :  { %2301 = vmatprep.subr.mxu1 %v2663_v0  ;;  %2316 = vmatprep.subr.mxu0 %v2663_v0 }
 0xb4d   :  { %2302 = vmatpush3.msra.mxu1 %v2822_v37  ;;  %2317 = vmatpush3.msra.mxu0 %v2739_v6 }
 0xb4e   :  { %2318 = vmatprep.subr.mxu0 %v2663_v0  ;;  %2322 = vmatprep.mubr.msk.f32.mxu0 %vm2664_vm0, %v2663_v0 }
 0xb4f   :  { %2319 = vmatpush3.msra.mxu0 %v2743_v7  ;;  %2325 = vmatprep.subr.mxu1 %v2663_v0 }
 0xb50   :  { %2320 = vmatprep.subr.mxu0 %v2663_v0 }
 0xb51   :  { %2321 = vmatpush3.msra.mxu0 %v2750_v9 }
 0xb52   :  { %2344 = vmatprep.subr.mxu0 %v2663_v0 }
 0xbfe   :  { %v931_v25 = vpop.f32.mrf.mxu1 }
 0xbff   :  { %v932_v26 = vadd.f32 %v2874_v45, %v931_v25 }
 0xc00   :  { %v2267_v27 = vpop.f32.mrf.mxu1 }
 0xc01   :  { %v1944_v28 = vmul.f32 -1.442695, %v932_v26 }
 0xc02   :  { %v1035_v35 = vpop.f32.mrf.mxu0 }
 0xc03   :  { %2496 = vpow2.f32 %v1944_v28  ;;  %v1036_v38 = vadd.f32 %v2779_v11, %v1035_v35 }
 0xc04   :  { %v2286_v39 = vpop.f32.mrf.mxu0 }
 0xc05   :  { %v1947_v40 = vmul.f32 -1.442695, %v1036_v38 }
 0xc07   :  { %2498 = vpow2.f32 %v1947_v40 }
 0xc08   :  { %2500 = vtanh.f32 %v932_v26 }
 0xc10   :  { %v2497_v41 = vpop.eup %2496 }
 0xc11   :  { %v939_v42 = vadd.f32 1.0, %v2497_v41 }
 0xc13   :  { %2502 = vrcp.f32 %v939_v42 }
 0xc14   :  { %v2499_v43 = vpop.eup %2498  ;;  %2504 = vtanh.f32 %v1036_v38 }
 0xc15   :  { %v1043_v44 = vadd.f32 1.0, %v2499_v43  ;;  %v2501_v46 = vpop.eup %2500 }
 0xc17   :  { %2506 = vrcp.f32 %v1043_v44 }
 0xc20   :  { %v2503_v47 = vpop.eup %2502 }
 0xc21   :  { %v942_v48 = vsel %vm2782_vm5, %v2501_v46, %v2503_v47  ;;  %v2505_v49 = vpop.eup %2504 }
 0xc22   :  { %945 = vrot.lane.b32.xlu0 %v942_v48, %s2665_s11  ;;  %v943_v56 = vmul.f32 %v942_v48, %v3018_v62 }
 0xc24   :  { %v2507_v50 = vpop.eup %2506 }
 0xc25   :  { %v1046_v51 = vsel %vm2782_vm5, %v2505_v49, %v2507_v50 }
 0xc26   :  { %1049 = vrot.lane.b32.xlu1 %v1046_v51, %s2665_s11  ;;  %v1047_v59 = vmul.f32 %v1046_v51, %v3022_v10 }
 0xc94   :  { %v946_v52 = vpop.permute.xlu0 %945 }
 0xc95   :  { %v948_v53 = vmul.f32 %v946_v52, %v942_v48 }
 0xc97   :  { %950 = vrot.lane.b32.xlu0 %v948_v53, %s2666_s12 }
 0xc98   :  { %v1050_v54 = vpop.permute.xlu1 %1049 }
 0xc99   :  { %v1052_v55 = vmul.f32 %v1050_v54, %v1046_v51 }
 0xc9b   :  { %1054 = vrot.lane.b32.xlu1 %v1052_v55, %s2666_s12 }
 0xd09   :  { %v951_v57 = vpop.permute.xlu0 %950 }
 0xd0a   :  { %v3084_v58 = vadd.f32 %v951_v57, %v943_v56 }
 0xd0c   :  { %2508 = vtanh.f32 %v3084_v58 }
 0xd0d   :  { %v1055_v60 = vpop.permute.xlu1 %1054 }
 0xd0e   :  { %v3088_v61 = vadd.f32 %v1055_v60, %v1047_v59 }
 0xd10   :  { %2510 = vtanh.f32 %v3088_v61 }
 0xd19   :  { %v2509_v63 = vpop.eup %2508 }
 0xd1a   :  { %956 = vrot.lane.b32.xlu0 %v2509_v63, %s2665_s11 }
 0xd1d   :  { %v2511_v8 = vpop.eup %2510 }
 0xd1e   :  { %1060 = vrot.lane.b32.xlu1 %v2511_v8, %s2665_s11 }
 0xd8c   :  { %v957_v13 = vpop.permute.xlu0 %956 }
 0xd8d   :  { %v959_v62 = vmul.f32 %v957_v13, %v942_v48 }
 0xd8f   :  { %1069 = vrot.lane.b32.xlu1 %v959_v62, %s2665_s11 }
 0xd90   :  { %v1061_v14 = vpop.permute.xlu1 %1060 }
 0xd91   :  { %v1063_v16 = vmul.f32 %v1061_v14, %v1046_v51  ;;  %v3201_v14 = vld [vmem:[%s3312_s3] ss:$0 sm:$0xff] }
 0xd93   :  { %1065 = vrot.lane.b32.xlu0 %v1063_v16, %s2666_s12 }
 0xd97   :  { %1173 = vrot.lane.b32.xlu0 %v1063_v16, %s2665_s11 }
 0xe01   :  { %v1070_v10 = vpop.permute.xlu1 %1069 }
 0xe05   :  { %v1066_v12 = vpop.permute.xlu0 %1065 }
 0xe06   :  { %v1072_v18 = vsel %vm43_vm1, %v1066_v12, %v1070_v10 }
 0xe07   :  { %2304 = vmatmul.mubr.msk.f32.vlgmr.msra.gmra.mxu1 %vm108_vm2, %v1072_v18 }
 0xe08   :  { %2326 = vmatpush3.msra.mxu1 %v2793_v29  ;;  %2341 = vmatprep.mubr.msk.f32.mxu1 %vm2664_vm0, %v2663_v0 }
 0xe09   :  { %v1174_v15 = vpop.permute.xlu0 %1173  ;;  %2327 = vmatprep.subr.mxu1 %v2663_v0 }
 0xe0a   :  { %v1176_v17 = vsel %vm43_vm1, %v1950_v21, %v1174_v15  ;;  %2328 = vmatpush3.msra.mxu1 %v2795_v30 }
 0xe0b   :  { %2323 = vmatmul.mubr.msk.f32.vlgmr.msra.gmra.mxu0 %vm108_vm2, %v1176_v17  ;;  %2329 = vmatprep.subr.mxu1 %v2663_v0 }
 0xe0c   :  { %2330 = vmatpush3.msra.mxu1 %v2799_v31  ;;  %2345 = vmatpush3.msra.mxu0 %v2721_v1 }
 0xe0d   :  { %2331 = vmatprep.subr.mxu1 %v2663_v0  ;;  %2346 = vmatprep.subr.mxu0 %v2663_v0 }
 0xe0e   :  { %2332 = vmatpush3.msra.mxu1 %v2803_v32  ;;  %2347 = vmatpush3.msra.mxu0 %v2723_v2 }
 0xe0f   :  { %2333 = vmatprep.subr.mxu1 %v2663_v0  ;;  %2348 = vmatprep.subr.mxu0 %v2663_v0 }
 0xe10   :  { %2334 = vmatpush3.msra.mxu1 %v2807_v33  ;;  %2349 = vmatpush3.msra.mxu0 %v2727_v3 }
 0xe11   :  { %2335 = vmatprep.subr.mxu1 %v2663_v0  ;;  %2350 = vmatprep.subr.mxu0 %v2663_v0 }
 0xe12   :  { %2336 = vmatpush3.msra.mxu1 %v2811_v34  ;;  %2351 = vmatpush3.msra.mxu0 %v2731_v4 }
 0xe13   :  { %2337 = vmatprep.subr.mxu1 %v2663_v0  ;;  %2352 = vmatprep.subr.mxu0 %v2663_v0 }
 0xe14   :  { %2338 = vmatpush3.msra.mxu1 %v2815_v36  ;;  %2353 = vmatpush3.msra.mxu0 %v2735_v5 }
 0xe15   :  { %2339 = vmatprep.subr.mxu1 %v2663_v0  ;;  %2354 = vmatprep.subr.mxu0 %v2663_v0 }
 0xe16   :  { %2340 = vmatpush3.msra.mxu1 %v2822_v37  ;;  %2355 = vmatpush3.msra.mxu0 %v2739_v6 }
 0xe17   :  { %2356 = vmatprep.subr.mxu0 %v2663_v0  ;;  %2360 = vmatprep.mubr.msk.f32.mxu0 %vm2664_vm0, %v2663_v0 }
 0xe18   :  { %2357 = vmatpush3.msra.mxu0 %v2743_v7  ;;  %2363 = vmatprep.subr.mxu1 %v2663_v0 }
 0xe19   :  { %2358 = vmatprep.subr.mxu0 %v2663_v0 }
 0xe1a   :  { %2359 = vmatpush3.msra.mxu0 %v2750_v9 }
 0xe1b   :  { %2382 = vmatprep.subr.mxu0 %v2663_v0 }
 0xec7   :  { %v1142_v1 = vpop.f32.mrf.mxu1 }
 0xec8   :  { %v1143_v2 = vadd.f32 %v2874_v45, %v1142_v1 }
 0xec9   :  { %v2305_v3 = vpop.f32.mrf.mxu1 }
 0xeca   :  { %v1949_v4 = vmul.f32 -1.442695, %v1143_v2 }
 0xecb   :  { %v1246_v5 = vpop.f32.mrf.mxu0 }
 0xecc   :  { %2512 = vpow2.f32 %v1949_v4  ;;  %v1247_v6 = vadd.f32 %v2779_v11, %v1246_v5 }
 0xecd   :  { %v2324_v22 = vpop.f32.mrf.mxu0 }
 0xece   :  { %v1952_v23 = vmul.f32 -1.442695, %v1247_v6 }
 0xed0   :  { %2514 = vpow2.f32 %v1952_v23 }
 0xed1   :  { %2516 = vtanh.f32 %v1143_v2 }
 0xed9   :  { %v2513_v7 = vpop.eup %2512 }
 0xeda   :  { %v1150_v19 = vadd.f32 1.0, %v2513_v7 }
 0xedc   :  { %2518 = vrcp.f32 %v1150_v19 }
 0xedd   :  { %v2515_v24 = vpop.eup %2514  ;;  %2520 = vtanh.f32 %v1247_v6 }
 0xede   :  { %v1254_v9 = vadd.f32 1.0, %v2515_v24  ;;  %v2517_v25 = vpop.eup %2516 }
 0xee0   :  { %2522 = vrcp.f32 %v1254_v9 }
 0xee9   :  { %v2519_v26 = vpop.eup %2518 }
 0xeea   :  { %v1153_v27 = vsel %vm2782_vm5, %v2517_v25, %v2519_v26  ;;  %v2521_v28 = vpop.eup %2520 }
 0xeeb   :  { %1156 = vrot.lane.b32.xlu1 %v1153_v27, %s2665_s11  ;;  %v1154_v42 = vmul.f32 %v1153_v27, %v3084_v58  ;;  %v1955_v58 = vld [vmem:[%s3309_s0 + $0xc] sm:$0x3] }
 0xeed   :  { %v2523_v11 = vpop.eup %2522 }
 0xeee   :  { %v1257_v35 = vsel %vm2782_vm5, %v2521_v28, %v2523_v11 }
 0xeef   :  { %1260 = vrot.lane.b32.xlu0 %v1257_v35, %s2665_s11  ;;  %v1258_v46 = vmul.f32 %v1257_v35, %v3088_v61  ;;  %v2576_v61 = vld [vmem:[#allocation2 + $0x38] sm:$0xff] }
 0xf5d   :  { %v1157_v38 = vpop.permute.xlu1 %1156 }
 0xf5e   :  { %v1159_v39 = vmul.f32 %v1157_v38, %v1153_v27 }
 0xf60   :  { %1161 = vrot.lane.b32.xlu1 %v1159_v39, %s2666_s12 }
 0xf61   :  { %v1261_v40 = vpop.permute.xlu0 %1260 }
 0xf62   :  { %v1263_v41 = vmul.f32 %v1261_v40, %v1257_v35 }
 0xf64   :  { %1265 = vrot.lane.b32.xlu0 %v1263_v41, %s2666_s12 }
 0xfd2   :  { %v1162_v43 = vpop.permute.xlu1 %1161 }
 0xfd3   :  { %v3150_v44 = vadd.f32 %v1162_v43, %v1154_v42 }
 0xfd5   :  { %2524 = vtanh.f32 %v3150_v44 }
 0xfd6   :  { %v1266_v47 = vpop.permute.xlu0 %1265 }
 0xfd7   :  { %v3154_v48 = vadd.f32 %v1266_v47, %v1258_v46  ;;  %v2585_v46 = vld [vmem:[#allocation2 + $0x78] sm:$0xff] }
 0xfd9   :  { %2526 = vtanh.f32 %v3154_v48 }
 0xfe2   :  { %v2525_v49 = vpop.eup %2524 }
 0xfe3   :  { %1167 = vrot.lane.b32.xlu1 %v2525_v49, %s2665_s11  ;;  %v2586_v49 = vld [vmem:[#allocation2 + $0x70] sm:$0xff] }
 0xfe6   :  { %v2527_v50 = vpop.eup %2526 }
 0xfe7   :  { %1271 = vrot.lane.b32.xlu0 %v2527_v50, %s2665_s11  ;;  %v2587_v50 = vld [vmem:[#allocation2 + $0x68] sm:$0xff] }
0x1055   :  { %v1168_v51 = vpop.permute.xlu1 %1167 }
0x1056   :  { %v1170_v52 = vmul.f32 %v1168_v51, %v1153_v27  ;;  %v2588_v51 = vld [vmem:[#allocation2 + $0x60] sm:$0xff] }
0x1058   :  { %1280 = vrot.lane.b32.xlu0 %v1170_v52, %s2665_s11  ;;  %v2589_v52 = vld [vmem:[#allocation2 + $0x58] sm:$0xff] }
0x1059   :  { %v1272_v53 = vpop.permute.xlu0 %1271 }
0x105a   :  { %v1274_v54 = vmul.f32 %v1272_v53, %v1257_v35  ;;  %v2590_v53 = vld [vmem:[#allocation2 + $0x50] sm:$0xff] }
0x105c   :  { %1276 = vrot.lane.b32.xlu1 %v1274_v54, %s2666_s12 }
0x1060   :  { %1384 = vrot.lane.b32.xlu1 %v1274_v54, %s2665_s11  ;;  %v2591_v54 = vld [vmem:[#allocation2 + $0x48] sm:$0xff] }
0x10ca   :  { %v1281_v55 = vpop.permute.xlu0 %1280 }
0x10ce   :  { %v1277_v56 = vpop.permute.xlu1 %1276 }
0x10cf   :  { %v1283_v57 = vsel %vm43_vm1, %v1277_v56, %v1281_v55  ;;  %v2592_v55 = vld [vmem:[#allocation2 + $0x40] sm:$0xff] }
0x10d0   :  { %2342 = vmatmul.mubr.msk.f32.vlgmr.msra.gmra.mxu1 %vm108_vm2, %v1283_v57  ;;  %v2593_v57 = vld [vmem:[%s3312_s3 + $0x1] ss:$0 sm:$0xff] }
0x10d1   :  { %2364 = vmatpush3.msra.mxu1 %v2793_v29  ;;  %2379 = vmatprep.mubr.msk.f32.mxu1 %vm2664_vm0, %v2663_v0  ;;  %v2577_v29 = vld [vmem:[#allocation2 + $0x30] sm:$0xff] }
0x10d2   :  { %v1385_v59 = vpop.permute.xlu1 %1384  ;;  %2365 = vmatprep.subr.mxu1 %v2663_v0 }
0x10d3   :  { %v1387_v60 = vsel %vm43_vm1, %v1955_v58, %v1385_v59  ;;  %2366 = vmatpush3.msra.mxu1 %v2795_v30  ;;  %v2578_v30 = vld [vmem:[#allocation2 + $0x28] sm:$0xff] }
0x10d4   :  { %2361 = vmatmul.mubr.msk.f32.vlgmr.msra.gmra.mxu0 %vm108_vm2, %v1387_v60  ;;  %2367 = vmatprep.subr.mxu1 %v2663_v0 }
0x10d5   :  { %2368 = vmatpush3.msra.mxu1 %v2799_v31  ;;  %2383 = vmatpush3.msra.mxu0 %v2576_v61  ;;  %v2579_v31 = vld [vmem:[#allocation2 + $0x20] sm:$0xff] }
0x10d6   :  { %2369 = vmatprep.subr.mxu1 %v2663_v0  ;;  %2384 = vmatprep.subr.mxu0 %v2663_v0 }
0x10d7   :  { %2370 = vmatpush3.msra.mxu1 %v2803_v32  ;;  %2385 = vmatpush3.msra.mxu0 %v2577_v29  ;;  %v2580_v32 = vld [vmem:[#allocation2 + $0x18] sm:$0xff] }
0x10d8   :  { %2371 = vmatprep.subr.mxu1 %v2663_v0  ;;  %2386 = vmatprep.subr.mxu0 %v2663_v0 }
0x10d9   :  { %2372 = vmatpush3.msra.mxu1 %v2807_v33  ;;  %2387 = vmatpush3.msra.mxu0 %v2578_v30  ;;  %v2581_v33 = vld [vmem:[#allocation2 + $0x10] sm:$0xff] }
0x10da   :  { %2373 = vmatprep.subr.mxu1 %v2663_v0  ;;  %2388 = vmatprep.subr.mxu0 %v2663_v0 }
0x10db   :  { %2374 = vmatpush3.msra.mxu1 %v2811_v34  ;;  %2389 = vmatpush3.msra.mxu0 %v2579_v31  ;;  %v2582_v34 = vld [vmem:[#allocation2 + $0x8] sm:$0xff] }
0x10dc   :  { %2375 = vmatprep.subr.mxu1 %v2663_v0  ;;  %2390 = vmatprep.subr.mxu0 %v2663_v0 }
0x10dd   :  { %2376 = vmatpush3.msra.mxu1 %v2815_v36  ;;  %2391 = vmatpush3.msra.mxu0 %v2580_v32  ;;  %v2583_v36 = vld [vmem:[#allocation2] sm:$0xff] }
0x10de   :  { %2377 = vmatprep.subr.mxu1 %v2663_v0  ;;  %2392 = vmatprep.subr.mxu0 %v2663_v0 }
0x10df   :  { %2378 = vmatpush3.msra.mxu1 %v2822_v37  ;;  %2393 = vmatpush3.msra.mxu0 %v2581_v33 }
0x10e0   :  { %2394 = vmatprep.subr.mxu0 %v2663_v0  ;;  %2398 = vmatprep.mubr.msk.f32.mxu0 %vm2664_vm0, %v2663_v0 }
0x10e1   :  { %2395 = vmatpush3.msra.mxu0 %v2582_v34  ;;  %2401 = vmatprep.subr.mxu1 %v2663_v0 }
0x10e2   :  { %2396 = vmatprep.subr.mxu0 %v2663_v0 }
0x10e3   :  { %2397 = vmatpush3.msra.mxu0 %v2583_v36 }
0x10e4   :  { %2420 = vmatprep.subr.mxu0 %v2663_v0 }
0x1190   :  { %v1353_v63 = vpop.f32.mrf.mxu1 }
0x1191   :  { %v1354_v37 = vadd.f32 %v2874_v45, %v1353_v63 }
0x1192   :  { %v2343_v8 = vpop.f32.mrf.mxu1 }
0x1193   :  { %v1954_v13 = vmul.f32 -1.442695, %v1354_v37 }
0x1194   :  { %v1457_v62 = vpop.f32.mrf.mxu0 }
0x1195   :  { %2528 = vpow2.f32 %v1954_v13  ;;  %v1458_v16 = vadd.f32 %v3201_v14, %v1457_v62 }
0x1196   :  { %v2362_v10 = vpop.f32.mrf.mxu0 }
0x1197   :  { %v1957_v12 = vmul.f32 -1.442695, %v1458_v16 }
0x1199   :  { %2530 = vpow2.f32 %v1957_v12 }
0x119a   :  { %2532 = vtanh.f32 %v1354_v37 }
0x11a2   :  { %v2529_v18 = vpop.eup %2528 }
0x11a3   :  { %v1361_v21 = vadd.f32 1.0, %v2529_v18 }
0x11a5   :  { %2534 = vrcp.f32 %v1361_v21 }
0x11a6   :  { %v2531_v15 = vpop.eup %2530  ;;  %2536 = vtanh.f32 %v1458_v16 }
0x11a7   :  { %v1465_v45 = vadd.f32 1.0, %v2531_v15  ;;  %v2533_v17 = vpop.eup %2532 }
0x11a9   :  { %2538 = vrcp.f32 %v1465_v45 }
0x11b2   :  { %v2535_v1 = vpop.eup %2534 }
0x11b3   :  { %v1364_v2 = vsel %vm2782_vm5, %v2533_v17, %v2535_v1  ;;  %v2537_v3 = vpop.eup %2536 }
0x11b4   :  { %1367 = vrot.lane.b32.xlu0 %v1364_v2, %s2665_s11  ;;  %v1365_v19 = vmul.f32 %v1364_v2, %v3150_v44  ;;  %v1960_v44 = vld [vmem:[%s3309_s0 + $0xe] sm:$0x3] }
0x11b6   :  { %v2539_v4 = vpop.eup %2538 }
0x11b7   :  { %v1468_v5 = vsel %vm2782_vm5, %v2537_v3, %v2539_v4 }
0x11b8   :  { %1471 = vrot.lane.b32.xlu1 %v1468_v5, %s2665_s11  ;;  %v1469_v25 = vmul.f32 %v1468_v5, %v3154_v48 }
0x1226   :  { %v1368_v6 = vpop.permute.xlu0 %1367 }
0x1227   :  { %v1370_v22 = vmul.f32 %v1368_v6, %v1364_v2 }
0x1229   :  { %1372 = vrot.lane.b32.xlu0 %v1370_v22, %s2666_s12 }
0x122a   :  { %v1472_v23 = vpop.permute.xlu1 %1471 }
0x122b   :  { %v1474_v7 = vmul.f32 %v1472_v23, %v1468_v5 }
0x122d   :  { %1476 = vrot.lane.b32.xlu1 %v1474_v7, %s2666_s12 }
0x129b   :  { %v1373_v24 = vpop.permute.xlu0 %1372 }
0x129c   :  { %v3213_v9 = vadd.f32 %v1373_v24, %v1365_v19 }
0x129e   :  { %2540 = vtanh.f32 %v3213_v9 }
0x129f   :  { %v1477_v26 = vpop.permute.xlu1 %1476 }
0x12a0   :  { %v3217_v27 = vadd.f32 %v1477_v26, %v1469_v25 }
0x12a2   :  { %2542 = vtanh.f32 %v3217_v27 }
0x12ab   :  { %v2541_v28 = vpop.eup %2540 }
0x12ac   :  { %1378 = vrot.lane.b32.xlu0 %v2541_v28, %s2665_s11 }
0x12af   :  { %v2543_v11 = vpop.eup %2542 }
0x12b0   :  { %1482 = vrot.lane.b32.xlu1 %v2543_v11, %s2665_s11 }
0x131e   :  { %v1379_v35 = vpop.permute.xlu0 %1378 }
0x131f   :  { %v1381_v38 = vmul.f32 %v1379_v35, %v1364_v2 }
0x1321   :  { %1491 = vrot.lane.b32.xlu1 %v1381_v38, %s2665_s11 }
0x1322   :  { %v1483_v39 = vpop.permute.xlu1 %1482 }
0x1323   :  { %v1485_v40 = vmul.f32 %v1483_v39, %v1468_v5 }
0x1325   :  { %1487 = vrot.lane.b32.xlu0 %v1485_v40, %s2666_s12 }
0x1329   :  { %1595 = vrot.lane.b32.xlu0 %v1485_v40, %s2665_s11 }
0x1393   :  { %v1492_v41 = vpop.permute.xlu1 %1491 }
0x1397   :  { %v1488_v42 = vpop.permute.xlu0 %1487 }
0x1398   :  { %v1494_v43 = vsel %vm43_vm1, %v1488_v42, %v1492_v41 }
0x1399   :  { %2380 = vmatmul.mubr.msk.f32.vlgmr.msra.gmra.mxu1 %vm108_vm2, %v1494_v43 }
0x139a   :  { %2402 = vmatpush3.msra.mxu1 %v2585_v46  ;;  %2417 = vmatprep.mubr.msk.f32.mxu1 %vm2664_vm0, %v2663_v0  ;;  %v1807_v46 = vld [vmem:[%s3313_s4 + $0x18] sm:$0xff] }
0x139b   :  { %v1596_v47 = vpop.permute.xlu0 %1595  ;;  %2403 = vmatprep.subr.mxu1 %v2663_v0 }
0x139c   :  { %v1598_v48 = vsel %vm43_vm1, %v1960_v44, %v1596_v47  ;;  %2404 = vmatpush3.msra.mxu1 %v2586_v49  ;;  %v1806_v47 = vld [vmem:[%s3313_s4 + $0x10] sm:$0xff] }
0x139d   :  { %2399 = vmatmul.mubr.msk.f32.vlgmr.msra.gmra.mxu0 %vm108_vm2, %v1598_v48  ;;  %2405 = vmatprep.subr.mxu1 %v2663_v0  ;;  %v1804_v48 = vld [vmem:[%s3313_s4] sm:$0xff] }
0x139e   :  { %2406 = vmatpush3.msra.mxu1 %v2587_v50  ;;  %2428 = vmatprep.mubr.msk.f32.mxu0 %vm2664_vm0, %v2663_v0 }
0x139f   :  { %2407 = vmatprep.subr.mxu1 %v2663_v0  ;;  %2421 = vmatpush3.msra.mxu0 %v1807_v46 }
0x13a0   :  { %2408 = vmatpush3.msra.mxu1 %v2588_v51  ;;  %2422 = vmatprep.subr.mxu0 %v2663_v0 }
0x13a1   :  { %2409 = vmatprep.subr.mxu1 %v2663_v0  ;;  %2423 = vmatpush3.msra.mxu0 %v1806_v47 }
0x13a2   :  { %2410 = vmatpush3.msra.mxu1 %v2589_v52  ;;  %2424 = vmatprep.subr.mxu0 %v2663_v0 }
0x13a3   :  { %2411 = vmatprep.subr.mxu1 %v2663_v0  ;;  %2425 = vmatpush3.msra.mxu0 %v1805_v20 }
0x13a4   :  { %2412 = vmatpush3.msra.mxu1 %v2590_v53  ;;  %2426 = vmatprep.subr.mxu0 %v2663_v0  ;;  %v41_v53 = vld [vmem:[%s3310_s1] sm:$0xff] }
0x13a5   :  { %2413 = vmatprep.subr.mxu1 %v2663_v0  ;;  %2427 = vmatpush3.msra.mxu0 %v1804_v48 }
0x13a6   :  { %2414 = vmatpush3.msra.mxu1 %v2591_v54  ;;  %v42_v54 = vld [vmem:[%s3310_s1 + $0x8] sm:$0xff]  ;;  %s2667_s1 = smov [#allocation5]  }
0x13a7   :  { %2415 = vmatprep.subr.mxu1 %v2663_v0  ;;  %v44_v0 = vsel %vm43_vm1, %v41_v53, -inf }
0x13a8   :  { %2416 = vmatpush3.msra.mxu1 %v2592_v55  ;;  %v51_v55 = vsel %vm43_vm1, %v42_v54, -inf }
0x1459   :  { %v1564_v56 = vpop.f32.mrf.mxu1 }
0x145a   :  { %v1565_v58 = vadd.f32 %v2593_v57, %v1564_v56  ;;  %v45_v56 = vrot.slane %v44_v0, 4 }
0x145b   :  { %v2381_v59 = vpop.f32.mrf.mxu1 }
0x145c   :  { %v1959_v60 = vmul.f32 -1.442695, %v1565_v58 }
0x145d   :  { %v1668_v61 = vpop.f32.mrf.mxu0 }
0x145e   :  { %2544 = vpow2.f32 %v1959_v60  ;;  %v1669_v29 = vadd.f32 %v3201_v14, %v1668_v61 }
0x145f   :  { %v2400_v30 = vpop.f32.mrf.mxu0 }
0x1460   :  { %v1962_v31 = vmul.f32 -1.442695, %v1669_v29 }
0x1462   :  { %2546 = vpow2.f32 %v1962_v31 }
0x1463   :  { %2548 = vtanh.f32 %v1565_v58  ;;  %v46_v58 = vmax.f32 %v44_v0, %v45_v56 }
0x1465   :  { %v47_v60 = vrot.slane %v46_v58, 2 }
0x146b   :  { %v2545_v32 = vpop.eup %2544 }
0x146c   :  { %v1572_v33 = vadd.f32 1.0, %v2545_v32 }
0x146e   :  { %2550 = vrcp.f32 %v1572_v33 }
0x146f   :  { %v2547_v34 = vpop.eup %2546  ;;  %2552 = vtanh.f32 %v1669_v29  ;;  %v48_v29 = vmax.f32 %v46_v58, %v47_v60 }
0x1470   :  { %v1676_v36 = vadd.f32 1.0, %v2547_v34  ;;  %v2549_v63 = vpop.eup %2548 }
0x1471   :  { %v49_v31 = vrot.slane %v48_v29, 1 }
0x1472   :  { %2554 = vrcp.f32 %v1676_v36 }
0x1473   :  { %v50_v33 = vmax.f32 %v48_v29, %v49_v31 }
0x1475   :  { %v58_v36 = vsub.f32 %v41_v53, %v50_v33 }
0x147b   :  { %v2551_v37 = vpop.eup %2550 }
0x147c   :  { %v1575_v8 = vsel %vm2782_vm5, %v2549_v63, %v2551_v37  ;;  %v2553_v13 = vpop.eup %2552  ;;  %v60_v37 = vmul.f32 1.442695, %v58_v36 }
0x147d   :  { %1578 = vrot.lane.b32.xlu1 %v1575_v8, %s2665_s11  ;;  %v1576_v21 = vmul.f32 %v1575_v8, %v3213_v9 }
0x147f   :  { %v2555_v62 = vpop.eup %2554 }
0x1480   :  { %v1679_v14 = vsel %vm2782_vm5, %v2553_v13, %v2555_v62 }
0x1481   :  { %1682 = vrot.lane.b32.xlu0 %v1679_v14, %s2665_s11  ;;  %v1680_v17 = vmul.f32 %v1679_v14, %v3217_v27 }
0x14ef   :  { %v1579_v16 = vpop.permute.xlu1 %1578 }
0x14f0   :  { %v1581_v10 = vmul.f32 %v1579_v16, %v1575_v8 }
0x14f2   :  { %1583 = vrot.lane.b32.xlu1 %v1581_v10, %s2666_s12 }
0x14f3   :  { %v1683_v12 = vpop.permute.xlu0 %1682 }
0x14f4   :  { %v1685_v18 = vmul.f32 %v1683_v12, %v1679_v14 }
0x14f6   :  { %1687 = vrot.lane.b32.xlu0 %v1685_v18, %s2666_s12 }
0x1564   :  { %v1584_v15 = vpop.permute.xlu1 %1583 }
0x1565   :  { %v1586_v45 = vadd.f32 %v1584_v15, %v1576_v21 }
0x1567   :  { %2556 = vtanh.f32 %v1586_v45 }
0x1568   :  { %v1688_v1 = vpop.permute.xlu0 %1687 }
0x1569   :  { %v1690_v2 = vadd.f32 %v1688_v1, %v1680_v17 }
0x156b   :  { %2558 = vtanh.f32 %v1690_v2 }
0x1574   :  { %v2557_v3 = vpop.eup %2556 }
0x1575   :  { %1589 = vrot.lane.b32.xlu1 %v2557_v3, %s2665_s11 }
0x1578   :  { %v2559_v4 = vpop.eup %2558 }
0x1579   :  { %1693 = vrot.lane.b32.xlu0 %v2559_v4, %s2665_s11 }
0x15e7   :  { %v1590_v5 = vpop.permute.xlu1 %1589 }
0x15e8   :  { %v1592_v6 = vmul.f32 %v1590_v5, %v1575_v8 }
0x15ea   :  { %1702 = vrot.lane.b32.xlu0 %v1592_v6, %s2665_s11 }
0x15eb   :  { %v1694_v22 = vpop.permute.xlu0 %1693 }
0x15ec   :  { %v1696_v23 = vmul.f32 %v1694_v22, %v1679_v14 }
0x15ee   :  { %1698 = vrot.lane.b32.xlu1 %v1696_v23, %s2666_s12 }
0x165c   :  { %v1703_v7 = vpop.permute.xlu0 %1702 }
0x1660   :  { %v1699_v19 = vpop.permute.xlu1 %1698 }
0x1661   :  { %v1705_v24 = vsel %vm43_vm1, %v1699_v19, %v1703_v7 }
0x1662   :  { %2418 = vmatmul.mubr.msk.f32.vlgmr.msra.gmra.mxu1 %vm108_vm2, %v1705_v24 }
0x1722   :  { %v1775_v9 = vpop.f32.mrf.mxu1 }
0x1723   :  { %v1776_v25 = vadd.f32 %v2593_v57, %v1775_v9  ;;  %v52_v57 = vrot.slane %v51_v55, 4 }
0x1724   :  { %v2419_v26 = vpop.f32.mrf.mxu1 }
0x1725   :  { %v1964_v27 = vmul.f32 -1.442695, %v1776_v25  ;;  %v53_v59 = vmax.f32 %v51_v55, %v52_v57 }
0x1727   :  { %2560 = vpow2.f32 %v1964_v27  ;;  %v54_v61 = vrot.slane %v53_v59, 2 }
0x1728   :  { %2562 = vtanh.f32 %v1776_v25 }
0x1729   :  { %v55_v30 = vmax.f32 %v53_v59, %v54_v61 }
0x172b   :  { %v56_v32 = vrot.slane %v55_v30, 1 }
0x172d   :  { %v57_v34 = vmax.f32 %v55_v30, %v56_v32 }
0x172f   :  { %v59_v63 = vsub.f32 %v42_v54, %v57_v34 }
0x1731   :  { %v62_v8 = vmul.f32 1.442695, %v59_v63 }
0x1734   :  { %v2561_v28 = vpop.eup %2560 }
0x1735   :  { %v1783_v11 = vadd.f32 1.0, %v2561_v28  ;;  %v2563_v35 = vpop.eup %2562 }
0x1737   :  { %2564 = vrcp.f32 %v1783_v11 }
0x1744   :  { %v2565_v38 = vpop.eup %2564 }
0x1745   :  { %v1786_v39 = vsel %vm2782_vm5, %v2563_v35, %v2565_v38 }
0x1746   :  { %1789 = vrot.lane.b32.xlu1 %v1786_v39, %s2665_s11  ;;  %v1787_v42 = vmul.f32 %v1786_v39, %v1586_v45 }
0x17b8   :  { %v1790_v40 = vpop.permute.xlu1 %1789 }
0x17b9   :  { %v1792_v41 = vmul.f32 %v1790_v40, %v1786_v39 }
0x17bb   :  { %1794 = vrot.lane.b32.xlu0 %v1792_v41, %s2666_s12 }
0x182d   :  { %v1795_v43 = vpop.permute.xlu0 %1794 }
0x182e   :  { %v1797_v44 = vadd.f32 %v1795_v43, %v1787_v42 }
0x1830   :  { %2566 = vtanh.f32 %v1797_v44 }
0x1831   :  { %2568 = vpow2.f32 %v60_v37 }
0x1832   :  { %2570 = vpow2.f32 %v62_v8 }
0x183d   :  { %v2567_v49 = vpop.eup %2566 }
0x183e   :  { %1800 = vrot.lane.b32.xlu1 %v2567_v49, %s2665_s11  ;;  %v2569_v13 = vpop.eup %2568  ;;  %s1897_s11 = sshll.u32 %s2667_s1, 4  ;;  %s1898_s11 = int_to_ptr.vmem [resolvable:$true] %s1897_s11 }
0x183f   :  { %v2571_v62 = vpop.eup %2570  ;;  %v64_v14 = vsel %vm43_vm1, %v2569_v13, 0.0  ;;  %p2619_p6 = scmp.lt.s32.totalorder %s1898_s11, %s1898_s11 }
0x1840   :  { %v65_v16 = vrot.slane %v64_v14, 4  ;;  %v71_v10 = vsel %vm43_vm1, %v2571_v62, 0.0 }
0x1841   :  { %v72_v12 = vrot.slane %v71_v10, 4 }
0x1842   :  { %v66_v18 = vadd.f32 %v65_v16, %v64_v14 }
0x1843   :  { %v73_v21 = vadd.f32 %v72_v12, %v71_v10 }
0x1844   :  { %v67_v15 = vrot.slane %v66_v18, 2 }
0x1845   :  { %v74_v45 = vrot.slane %v73_v21, 2 }
0x1846   :  { %v68_v17 = vadd.f32 %v67_v15, %v66_v18 }
0x1847   :  { %v75_v1 = vadd.f32 %v74_v45, %v73_v21 }
0x1848   :  { %v69_v2 = vrot.slane %v68_v17, 1 }
0x1849   :  { %v76_v3 = vrot.slane %v75_v1, 1 }
0x184a   :  { %v70_v4 = vadd.f32 %v69_v2, %v68_v17 }
0x184b   :  { %v77_v5 = vadd.f32 %v76_v3, %v75_v1 }
0x184c   :  { %2572 = vlog2.f32 %v70_v4 }
0x184d   :  { %2574 = vlog2.f32 %v77_v5 }
0x1859   :  { %v2573_v6 = vpop.eup %2572 }
0x185a   :  { %v2575_v22 = vpop.eup %2574  ;;  %v79_v23 = vmul.f32 0.6931472, %v2573_v6 }
0x185b   :  { %v81_v7 = vmul.f32 0.6931472, %v2575_v22 }
0x185c   :  { %v82_v19 = vsub.f32 %v58_v36, %v79_v23 }
0x185d   :  { %v83_v24 = vsub.f32 %v59_v63, %v81_v7 }
0x185e   :  { %84 = vst.msk [vmem:[#allocation5] sm:$0xff] %vm43_vm1, %v82_v19 }
0x185f   :  { %85 = vst.msk [vmem:[#allocation5 + $0x8] sm:$0xff] %vm43_vm1, %v83_v24 }
0x18b0   :  { %v1801_v50 = vpop.permute.xlu1 %1800 }
0x18b1   :  { %v1803_v51 = vmul.f32 %v1801_v50, %v1786_v39 }
0x18b3   :  { %1816 = vrot.lane.b32.xlu0 %v1803_v51, %s2666_s12  ;;  %s2614_s12 = scalar_lea.vmem %s1898_s11, 256 }
0x18b4   :  { %p2615_p5 = scmp.ne.s32.totalorder %s1898_s11, %s2614_s12  ;;  %p2620_p7 = scmp.lt.s32.totalorder %s2614_s12, %s2614_s12 }
0x18b6   :  { %p2621_p8 = por %p2620_p7, %p2619_p6 }
0x18b8   :  { %p2622_p9 = pnand %p2621_p8, %p2615_p5 }
0x1925   :  { %v1817_v52 = vpop.permute.xlu0 %1816 }
0x1926   :  { %2429 = vmatmul.mubr.msk.f32.vlgmr.msra.gmra.mxu0 %vm43_vm1, %v1817_v52 }
0x1927   :  { %2625 = shalt.err (!%p2622_p9)
}
0x1928   :  { %1903 = dma.vmem_to_hbm [thread:$0]  %s1898_s11, 256, %s3315_s6, [#allocation4], %s2661_s27, %s2661_s27, %s2662_s28   ;;  %vm1890_vm6 = vcmask 58368  }
0x1929   :  { %v1965_v9 = vld [vmem:[%s3314_s5] ss:$0 sm:$0xff]  ;;  %s2668_s26 = smov [#allocation6]  }
0x192a   :  { %s1910_s29 = sshll.u32 %s2668_s26, 4  ;;  %s1911_s29 = int_to_ptr.vmem [resolvable:$true] %s1910_s29 }
0x192b   :  { %s2634_s30 = scalar_lea.vmem %s1911_s29, 32  ;;  %p2639_p11 = scmp.lt.s32.totalorder %s1911_s29, %s1911_s29 }
0x192c   :  { %p2635_p10 = scmp.ne.s32.totalorder %s1911_s29, %s2634_s30  ;;  %p2640_p12 = scmp.lt.s32.totalorder %s2634_s30, %s2634_s30 }
0x192e   :  { %p2641_p13 = por %p2640_p12, %p2639_p11 }
0x1930   :  { %p2642_p0 = pnand %p2641_p13, %p2635_p10 }
0x19e6   :  { %v1886_v25 = vpop.f32.mrf.mxu0 }
0x19e7   :  { %v1887_v26 = vadd.f32 %v1965_v9, %v1886_v25 }
0x19e8   :  { %v2430_v27 = vpop.f32.mrf.mxu0 }
0x19e9   :  { %1891 = vst.msk [vmem:[#allocation6] sm:$0x3] %vm1890_vm6, %v1887_v26 }
0x19ea   :  { %2645 = shalt.err (!%p2642_p0)
}
0x19eb   :  { %1913 = dma.vmem_to_hbm [thread:$0]  %s1911_s29, 32, %s3316_s7, [#allocation7]  }
0x19ec   :  { %2656 = dma.done.wait [#allocation4], 256  }
0x19ed   :  { %2657 = vsyncadd [#allocation4], 4294967040 }
0x19ee   :  { %2658 = dma.done.wait [#allocation7], 32  }
0x19ef   :  { %2659 = vsyncadd [#allocation7], 4294967264 }
0x19f0   :  { %1920 = vsyncpa [#allocation3], 1 }
0x19f1   :  { %1921 = vsyncpa [#allocation4], 1 }
0x19f2   :  { %1922 = vsyncpa [#allocation7], 1 }

</bundles_post_ra>
